<compile_context>
chip_gen: v5e
topology: v5e:2x2
jax: 0.10.0
libtpu: 0.0.40
codegen_flags: <defaults>
</compile_context>

<pallas_src>
import jax
import jax.numpy as jnp
from jax import lax
from jax.experimental import pallas as pl
from jax.experimental.pallas import tpu as pltpu


def qvalue_kernel(s_ref, a_ref, w1_ref, b1_ref, w2_ref, b2_ref, w3_ref, b3_ref,
                  o_ref):
    """Fused 3-layer MLP; batch-on-lanes activations ([features, batch_tile])."""
    # torch.cat([s, a], dim=1) done in VMEM on the current batch tile; cast to
    # bf16 only for the MXU operands.
    x = jnp.concatenate([s_ref[...], a_ref[...]], axis=1)            # (tb, d0) f32
    x16 = x.astype(jnp.bfloat16)

    # Layer 1: h1 = W1 @ x^T + b1 -> (H, tb). Single contraction; the transpose
    # of x is folded into the contraction dims. bf16 operands, f32 accumulation.
    h1 = lax.dot_general(w1_ref[...], x16, (((1,), (1,)), ((), ())),
                         preferred_element_type=jnp.float32) + b1_ref[...]
    h1 = jnp.maximum(h1, 0.0)                                        # ReLU (f32)

    # Layer 2: (H, H) @ (H, tb) -> (H, tb)
    h2 = jnp.dot(w2_ref[...], h1.astype(jnp.bfloat16),
                 preferred_element_type=jnp.float32) + b2_ref[...]
    h2 = jnp.maximum(h2, 0.0)                                        # ReLU (f32)

    # Layer 3: (1, H) @ (H, tb) -> lane-dense (1, tb) output row.
    q = jnp.dot(w3_ref[...], h2.astype(jnp.bfloat16),
                preferred_element_type=jnp.float32) + b3_ref[...]
    o_ref[...] = q.astype(o_ref.dtype)


def _pick_batch_tile(B):
    # 256-wide tiles fill the 256-wide MXU N dim on v6e/v7x; only pick them when
    # the grid still has >= 2 steps (pipelining + both v7x TensorCores busy).
    # Otherwise 128 (fills v5e's 128-wide MXU; 2 steps at B=256). Ragged batches
    # get a partial last tile via a cdiv grid — never a giant tb=B block.
    if B >= 512:
        return 256
    return 128


def _input_spec(block_shape, index_map, num_steps):
    # Buffer depth tied to grid length: 3-deep prefetch only pays with >= 3
    # steps; otherwise keep the default double-buffering. Falls back cleanly if
    # this jax version lacks the pipeline_mode kwarg.
    bufs = 3 if num_steps >= 3 else 2
    if hasattr(pl, "Buffered"):
        try:
            return pl.BlockSpec(block_shape, index_map,
                                pipeline_mode=pl.Buffered(bufs))
        except TypeError:
            pass
    return pl.BlockSpec(block_shape, index_map)


def qvalue_forward(s, a, params, *, batch_tile=None):
    """s: [B, n_in] f32, a: [B, n_acs] f32 -> q: [B, 1] f32.

    B need not divide the batch tile: the grid is cdiv(B, tb) with a partial
    last tile. Batch is a non-contracting dim, so OOB-padded columns only land
    in the part of the (1, B) output that is dropped on writeback.
    """
    w1, b1, w2, b2, w3, b3 = params
    B, n_in = s.shape
    _, n_acs = a.shape

    tb = _pick_batch_tile(B) if batch_tile is None else batch_tile
    num_steps = int(pl.cdiv(B, tb))
    grid = (num_steps,)

    # Weights/biases: small, constant block index, fully VMEM-resident.
    full = lambda arr: pl.BlockSpec(arr.shape, lambda i: (0, 0))

    q_row = pl.pallas_call(
        qvalue_kernel,
        out_shape=jax.ShapeDtypeStruct((1, B), jnp.float32),
        grid_spec=pltpu.PrefetchScalarGridSpec(
            num_scalar_prefetch=0,
            grid=grid,
            in_specs=[
                _input_spec((tb, n_in), lambda i: (i, 0), num_steps),    # s tile
                _input_spec((tb, n_acs), lambda i: (i, 0), num_steps),   # a tile
                full(w1), full(b1),
                full(w2), full(b2),
                full(w3), full(b3),
            ],
            out_specs=pl.BlockSpec((1, tb), lambda i: (0, i)),           # lane-dense
        ),
        compiler_params=pltpu.CompilerParams(
            dimension_semantics=("parallel",)),
    )(s, a, w1, b1, w2, b2, w3, b3)

    # (1, B) row -> (B, 1) column. A small lane->sublane relayout copy (~4*B
    # bytes); negligible but not zero-cost.
    return q_row.reshape(B, 1)


def init_params(key, n_in, n_acs, hidden):
    """Deterministic init mimicking the PyTorch module.

    Hidden layers: nn.Linear default U(-1/sqrt(fan_in), 1/sqrt(fan_in)).
    Final layer: U(-0.003, 0.003) for weight and bias (as in __init__).
    Weights stored [out, in] (PyTorch layout) in bf16 (MXU-native operands);
    biases stored [out, 1] in f32 for the batch-on-lanes layout.
    """
    k1, k2, k3, k4, k5, k6 = jax.random.split(key, 6)
    d0 = n_in + n_acs

    def u(k, shape, bound, dtype):
        return jax.random.uniform(k, shape, jnp.float32, -bound, bound).astype(dtype)

    w1 = u(k1, (hidden, d0), d0 ** -0.5, jnp.bfloat16)
    b1 = u(k2, (hidden, 1), d0 ** -0.5, jnp.float32)
    w2 = u(k3, (hidden, hidden), hidden ** -0.5, jnp.bfloat16)
    b2 = u(k4, (hidden, 1), hidden ** -0.5, jnp.float32)
    w3 = u(k5, (1, hidden), 0.003, jnp.bfloat16)
    b3 = u(k6, (1, 1), 0.003, jnp.float32)
    return (w1, b1, w2, b2, w3, b3)


def qvalue_ref(s, a, params):
    """Pure-JAX reference mirroring the PyTorch forward, with the same bf16
    matmul operands / f32 accumulation as the kernel (keeps tolerances tight)."""
    w1, b1, w2, b2, w3, b3 = params
    x = jnp.concatenate([s, a], axis=1).astype(jnp.bfloat16)
    h1 = jnp.maximum(
        jnp.dot(x, w1.T, preferred_element_type=jnp.float32) + b1.T, 0.0)
    h2 = jnp.maximum(
        jnp.dot(h1.astype(jnp.bfloat16), w2.T,
                preferred_element_type=jnp.float32) + b2.T, 0.0)
    return jnp.dot(h2.astype(jnp.bfloat16), w3.T,
                   preferred_element_type=jnp.float32) + b3.T


if __name__ == "__main__":
    # Small shapes consistent with the module (hidden matches the 256 default).
    B, N_IN, N_ACS, HIDDEN = 256, 32, 8, 256

    key = jax.random.PRNGKey(0)
    ks, ka, kp = jax.random.split(key, 3)
    s = jax.random.normal(ks, (B, N_IN), jnp.float32)
    a = jax.random.normal(ka, (B, N_ACS), jnp.float32)
    params = init_params(kp, N_IN, N_ACS, HIDDEN)

    q = qvalue_forward(s, a, params)     # B=256 -> tb=128, grid=(2,)
    q = jax.block_until_ready(q)

    q_ref = qvalue_ref(s, a, params)
    assert q.shape == (B, 1)
    assert bool(jnp.all(jnp.isfinite(q)))
    assert jnp.allclose(q, q_ref, atol=1e-3, rtol=1e-3), "mismatch vs reference"

    print("KERNEL_OK")
</pallas_src>

<mosaic_0001>
module attributes {stable_mosaic.version = 11 : i64} {
  func.func @qvalue_kernel(%arg0: i32, %arg1: memref<128x32xf32, #tpu.memory_space<vmem>>, %arg2: memref<128x8xf32, #tpu.memory_space<vmem>>, %arg3: memref<256x40xbf16, #tpu.memory_space<vmem>>, %arg4: memref<256x1xf32, #tpu.memory_space<vmem>>, %arg5: memref<256x256xbf16, #tpu.memory_space<vmem>>, %arg6: memref<256x1xf32, #tpu.memory_space<vmem>>, %arg7: memref<1x256xbf16, #tpu.memory_space<vmem>>, %arg8: memref<1x1xf32, #tpu.memory_space<vmem>>, %arg9: memref<1x128xf32, #tpu.memory_space<vmem>>) attributes {dimension_semantics = [#tpu.dimension_semantics<parallel>], iteration_bounds = array<i64: 2>, scalar_prefetch = 0 : i64, scratch_operands = 0 : i64, tpu.core_type = #tpu.core_type<tc>, window_params = [{pipeline_mode = #tpu.pipeline_mode<double_buffered>, transform_indices = @transform_0, window_bounds = array<i64: 128, 32>}, {pipeline_mode = #tpu.pipeline_mode<double_buffered>, transform_indices = @transform_1, window_bounds = array<i64: 128, 8>}, {pipeline_mode = #tpu.pipeline_mode<synchronous>, transform_indices = @transform_2, window_bounds = array<i64: 256, 40>}, {pipeline_mode = #tpu.pipeline_mode<synchronous>, transform_indices = @transform_3, window_bounds = array<i64: 256, 1>}, {pipeline_mode = #tpu.pipeline_mode<synchronous>, transform_indices = @transform_4, window_bounds = array<i64: 256, 256>}, {pipeline_mode = #tpu.pipeline_mode<synchronous>, transform_indices = @transform_5, window_bounds = array<i64: 256, 1>}, {pipeline_mode = #tpu.pipeline_mode<synchronous>, transform_indices = @transform_6, window_bounds = array<i64: 1, 256>}, {pipeline_mode = #tpu.pipeline_mode<synchronous>, transform_indices = @transform_7, window_bounds = array<i64: 1, 1>}, {transform_indices = @transform_8, window_bounds = array<i64: 1, 128>}]} {
    %c0 = arith.constant 0 : index
    %c0_0 = arith.constant 0 : index
    %0 = vector.load %arg1[%c0, %c0_0] : memref<128x32xf32, #tpu.memory_space<vmem>>, vector<128x32xf32>
    %c0_1 = arith.constant 0 : index
    %c0_2 = arith.constant 0 : index
    %1 = vector.load %arg2[%c0_1, %c0_2] : memref<128x8xf32, #tpu.memory_space<vmem>>, vector<128x8xf32>
    %2 = tpu.concatenate %0, %1 in 1 : vector<128x32xf32>, vector<128x8xf32> -> vector<128x40xf32>
    %3 = arith.truncf %2 : vector<128x40xf32> to vector<128x40xbf16>
    %c0_3 = arith.constant 0 : index
    %c0_4 = arith.constant 0 : index
    %4 = vector.load %arg3[%c0_3, %c0_4] : memref<256x40xbf16, #tpu.memory_space<vmem>>, vector<256x40xbf16>
    %cst = arith.constant dense<0.000000e+00> : vector<256x128xf32>
    %5 = tpu.matmul %4, %3, %cst {dimension_numbers = #tpu.dot_dimension_numbers<[1], [1], [0], [0], [0, 0, 1, 0], [], []>} : vector<256x40xbf16>, vector<128x40xbf16>, vector<256x128xf32> -> vector<256x128xf32>
    %c0_5 = arith.constant 0 : index
    %c0_6 = arith.constant 0 : index
    %6 = vector.load %arg4[%c0_5, %c0_6] : memref<256x1xf32, #tpu.memory_space<vmem>>, vector<256x1xf32>
    %7 = vector.broadcast %6 : vector<256x1xf32> to vector<256x128xf32>
    %8 = arith.addf %5, %7 : vector<256x128xf32>
    %cst_7 = arith.constant 0.000000e+00 : f32
    %9 = vector.broadcast %cst_7 : f32 to vector<256x128xf32>
    %10 = arith.maximumf %8, %9 : vector<256x128xf32>
    %c0_8 = arith.constant 0 : index
    %c0_9 = arith.constant 0 : index
    %11 = vector.load %arg5[%c0_8, %c0_9] : memref<256x256xbf16, #tpu.memory_space<vmem>>, vector<256x256xbf16>
    %12 = arith.truncf %10 : vector<256x128xf32> to vector<256x128xbf16>
    %cst_10 = arith.constant dense<0.000000e+00> : vector<256x128xf32>
    %13 = tpu.matmul %11, %12, %cst_10 {dimension_numbers = #tpu.dot_dimension_numbers<[1], [0], [0], [1], [0, 0, 1, 1], [], []>} : vector<256x256xbf16>, vector<256x128xbf16>, vector<256x128xf32> -> vector<256x128xf32>
    %c0_11 = arith.constant 0 : index
    %c0_12 = arith.constant 0 : index
    %14 = vector.load %arg6[%c0_11, %c0_12] : memref<256x1xf32, #tpu.memory_space<vmem>>, vector<256x1xf32>
    %15 = vector.broadcast %14 : vector<256x1xf32> to vector<256x128xf32>
    %16 = arith.addf %13, %15 : vector<256x128xf32>
    %cst_13 = arith.constant 0.000000e+00 : f32
    %17 = vector.broadcast %cst_13 : f32 to vector<256x128xf32>
    %18 = arith.maximumf %16, %17 : vector<256x128xf32>
    %c0_14 = arith.constant 0 : index
    %c0_15 = arith.constant 0 : index
    %19 = vector.load %arg7[%c0_14, %c0_15] : memref<1x256xbf16, #tpu.memory_space<vmem>>, vector<1x256xbf16>
    %20 = arith.truncf %18 : vector<256x128xf32> to vector<256x128xbf16>
    %cst_16 = arith.constant dense<0.000000e+00> : vector<1x128xf32>
    %21 = tpu.matmul %19, %20, %cst_16 {dimension_numbers = #tpu.dot_dimension_numbers<[1], [0], [0], [1], [0, 0, 1, 1], [], []>} : vector<1x256xbf16>, vector<256x128xbf16>, vector<1x128xf32> -> vector<1x128xf32>
    %c0_17 = arith.constant 0 : index
    %c0_18 = arith.constant 0 : index
    %22 = vector.load %arg8[%c0_17, %c0_18] : memref<1x1xf32, #tpu.memory_space<vmem>>, vector<1x1xf32>
    %23 = vector.broadcast %22 : vector<1x1xf32> to vector<1x128xf32>
    %24 = arith.addf %21, %23 : vector<1x128xf32>
    %c0_19 = arith.constant 0 : index
    %c0_20 = arith.constant 0 : index
    %25 = vector.load %arg9[%c0_19, %c0_20] : memref<1x128xf32, #tpu.memory_space<vmem>>, vector<1x128xf32>
    tpu.vector_store %arg9[%c0_19, %c0_20], %24 {strides = array<i32>} : memref<1x128xf32, #tpu.memory_space<vmem>>, vector<1x128xf32>,
    return
  }
  func.func @transform_0(%arg0: i32) -> (i32, i32) {
    %c0_i32 = arith.constant 0 : i32
    %c0_i32_0 = arith.constant 0 : i32
    return %arg0, %c0_i32 : i32, i32
  }
  func.func @transform_1(%arg0: i32) -> (i32, i32) {
    %c0_i32 = arith.constant 0 : i32
    %c0_i32_0 = arith.constant 0 : i32
    return %arg0, %c0_i32 : i32, i32
  }
  func.func @transform_2(%arg0: i32) -> (i32, i32) {
    %c0_i32 = arith.constant 0 : i32
    %c0_i32_0 = arith.constant 0 : i32
    %c0_i32_1 = arith.constant 0 : i32
    return %c0_i32, %c0_i32_0 : i32, i32
  }
  func.func @transform_3(%arg0: i32) -> (i32, i32) {
    %c0_i32 = arith.constant 0 : i32
    %c0_i32_0 = arith.constant 0 : i32
    %c0_i32_1 = arith.constant 0 : i32
    return %c0_i32, %c0_i32_0 : i32, i32
  }
  func.func @transform_4(%arg0: i32) -> (i32, i32) {
    %c0_i32 = arith.constant 0 : i32
    %c0_i32_0 = arith.constant 0 : i32
    %c0_i32_1 = arith.constant 0 : i32
    return %c0_i32, %c0_i32_0 : i32, i32
  }
  func.func @transform_5(%arg0: i32) -> (i32, i32) {
    %c0_i32 = arith.constant 0 : i32
    %c0_i32_0 = arith.constant 0 : i32
    %c0_i32_1 = arith.constant 0 : i32
    return %c0_i32, %c0_i32_0 : i32, i32
  }
  func.func @transform_6(%arg0: i32) -> (i32, i32) {
    %c0_i32 = arith.constant 0 : i32
    %c0_i32_0 = arith.constant 0 : i32
    %c0_i32_1 = arith.constant 0 : i32
    return %c0_i32, %c0_i32_0 : i32, i32
  }
  func.func @transform_7(%arg0: i32) -> (i32, i32) {
    %c0_i32 = arith.constant 0 : i32
    %c0_i32_0 = arith.constant 0 : i32
    %c0_i32_1 = arith.constant 0 : i32
    return %c0_i32, %c0_i32_0 : i32, i32
  }
  func.func @transform_8(%arg0: i32) -> (i32, i32) {
    %c0_i32 = arith.constant 0 : i32
    %c0_i32_0 = arith.constant 0 : i32
    return %c0_i32, %arg0 : i32, i32
  }
}

</mosaic_0001>

<bundles_post_ra>
// kernel: tpu_custom_call.1
= control target key start
LH: loop header
LB: loop body
LE: loop exit
PB: predicated region body
PF: predicated region fallthrough
CT: control target
= control target key end

     0   :  { %s2975_s0 = inlined_call_operand.vmem [shape: f32[256,32], index: 0, kind: input, shape index: {}]   ;;  %s2976_s1 = inlined_call_operand.vmem [shape: f32[256,8], index: 1, kind: input, shape index: {}]   ;;  %s2977_s2 = inlined_call_operand.vmem [shape: bf16[256,40], index: 2, kind: input, shape index: {}]   ;;  %s2978_s3 = inlined_call_operand.vmem [shape: f32[256,1], index: 3, kind: input, shape index: {}]   ;;  %s2979_s4 = inlined_call_operand.vmem [shape: bf16[256,256], index: 4, kind: input, shape index: {}]   ;;  %s2980_s5 = inlined_call_operand.vmem [shape: f32[256,1], index: 5, kind: input, shape index: {}]   ;;  %s2981_s6 = inlined_call_operand.vmem [shape: bf16[1,256], index: 6, kind: input, shape index: {}]   ;;  %s2982_s7 = inlined_call_operand.<no memory space> [shape: f32[1,1], index: 7, kind: input, shape index: {}]   ;;  %s2983_s8 = inlined_call_operand.hbm [shape: f32[1,256], index: 8, kind: output, shape index: {}]  }
   0x1   :  { %v13_v0 = vstv %s2982_s7 }
   0x2   :  { %14 = vst [vmem:[#allocation2] sm:$0x1] %v13_v0 }
   0x3   :  { %15 = vsyncpa [#allocation4], 0 }
   0x4   :  { %17 = vsyncpa [#allocation4 + $0x1], 0  ;;  %s2183_s29 = smov 0   ;;  %s2185_s30 = smov 0  }
   0x5   :  { %s2187_s9 = smov 0   ;;  %s2189_s10 = smov 0  }
   0x6 LB: > { %s2204_s7 = sadd.s32 4294967295, %s2131_s10   ;;  %s1695_s11 = sadd.s32 4294967294, %s2131_s10   ;;  %s2131_s10 = sphi %s2189_s10, %s2989_s10   ;;  %s2127_s9 = sphi %s2187_s9, %s2988_s9   ;;  %s2123_s30 = sphi %s2185_s30, %s2987_s30   ;;  %s2119_s29 = sphi %s2183_s29, %s2986_s29  }
   0x7   : > { %s2208_s12 = sadd.s32 1, %s2131_s10   ;;  %s208_s13 = sadd.s32 1, %s2127_s9 }
   0x8   : > { %s205_s14 = ssub.s32 %s2131_s10, %s2208_s12  ;;  %p218_p0 = scmp.ne.s32.totalorder %s2127_s9, %s2123_s30 }
   0x9   : > { %p206_p1 = scmp.eq.s32.totalorder %s205_s14, 0  ;;  %p219_p2 = scmp.eq.s32.totalorder %s2204_s7, 1 }
   0xa   : > { %p224_p3 = scmp.ne.s32.totalorder %s2123_s30, %s2119_s29  ;;  %p225_p4 = scmp.eq.s32.totalorder %s1695_s11, 1 }
   0xb   : > { %s2219_s15 = scalar_select %p206_p1, %s2127_s9, %s208_s13  }
   0xc   : > { %p2221_p5 = por %p219_p2, %p218_p0  ;;  %p2225_p6 = por %p225_p4, %p224_p3 }
   0xd   : > { %p1698_p7 = scmp.ge.s32.totalorder %s2131_s10, 1  ;;  %p279_p8 = scmp.lt.s32.totalorder %s2131_s10, 3 }
   0xf   : > { %p280_p9 = pnand %p1698_p7, %p279_p8 }
  0x10   : > { %s1699_s18 = sshll.u32 (!%p280_p9), %s2204_s7, 4  ;;  %s2133_s23 = smov (!%p280_p9), 32  }
  0x11   : > { %283 = sbr.rel (%p280_p9) target bundleno = 1060 (0x424), region = 52  ;;  %p318_p10 = scmp.lt.s32.totalorder (!%p280_p9), %s1699_s18, 31 }
  0x12   : > { %s315_s28 = sand.u32 (!%p280_p9), 1, %s2123_s30   ;;  %s1624_s13 = scalar_lea.hbm (!%p280_p9), %s2983_s8, %s2204_s7 }
  0x13   : > { %s1628_s14 = sshll.u32 (!%p280_p9), %s1624_s13, 4  ;;  %s1616_s20 = scalar_lea.sflag (!%p280_p9), [#allocation4], %s315_s28  ;;  %s1629_s14 = int_to_ptr.hbm [resolvable:$true] %s1628_s14 }
  0x14   : > { %s2083_s21 = sshra.s32 (!%p280_p9), %s1629_s14, 4  ;;  %s2089_s24 = scalar_lea.hbm (!%p280_p9), %s2983_s8, 2  ;;  %s2084_s21 = int_to_ptr.hbm [resolvable:$true] %s2083_s21 }
  0x15   : > { %p2090_p0 = scmp.lt.s32.totalorder (!%p280_p9), %s2084_s21, %s2983_s8 }
  0x16   : > { %s2991_s18 = smov (!%p318_p10, %s1699_s18), 31  ;;  %v2134_v25 = vmov 0   ;;  %v513_v26 = vld [vmem:[%s2978_s3 + $0xf8] sm:$0xff]  ;;  %v496_v27 = vld [vmem:[%s2978_s3 + $0x70] sm:$0xff]  ;;  %v494_v28 = vld [vmem:[%s2978_s3 + $0x60] sm:$0xff]  ;;  %vm425_vm0 = vcmask 261120  }
  0x17   : > { %s1700_s19 = sshll.u32 %s2991_s18, 3  ;;  %2068 = vset.pattern.permute.xlu1 %v2134_v25  ;;  %2067 = vset.pattern.permute.xlu0 %v2134_v25  ;;  %v510_v29 = vld [vmem:[%s2978_s3 + $0xe0] sm:$0xff]  ;;  %v509_v30 = vld [vmem:[%s2978_s3 + $0xd8] sm:$0xff]  ;;  %v495_v31 = vld [vmem:[%s2978_s3 + $0x68] sm:$0xff]  ;;  %vm754_vm1 = vcmask 326656   ;;  %s316_s18 = scalar_lea.vmem [#allocation3], %s315_s28 }
  0x18   : > { %s327_s22 = scalar_lea.vmem %s2976_s1, %s1700_s19  ;;  %2066 = vset.pattern.permute.xlu2 %v2134_v25  ;;  %s2263_s26 = scalar_lea.vmem %s2975_s0, %s1700_s19  ;;  %v506_v32 = vld [vmem:[%s2978_s3 + $0xc0] sm:$0xff]  ;;  %v492_v33 = vld [vmem:[%s2978_s3 + $0x50] sm:$0xff]  ;;  %v491_v44 = vld [vmem:[%s2978_s3 + $0x48] sm:$0xff] }
  0x19   : > { %v359_v1 = vld [vmem:[%s327_s22 + $0x70] sm:$0xff]  ;;  %v360_v2 = vld [vmem:[%s327_s22 + $0x78] sm:$0xff]  ;;  %v357_v9 = vld [vmem:[%s327_s22 + $0x60] sm:$0xff]  ;;  %s1626_s19 = sshll.u32 %s316_s18, 4  ;;  %s1627_s19 = int_to_ptr.vmem [resolvable:$true] %s1626_s19 }
  0x1a   : > { %v2026_v3 = vpack.i.bf16 %v360_v2, %v359_v1  ;;  %v355_v4 = vld [vmem:[%s327_s22 + $0x50] sm:$0xff]  ;;  %v356_v5 = vld [vmem:[%s327_s22 + $0x58] sm:$0xff]  ;;  %v358_v10 = vld [vmem:[%s327_s22 + $0x68] sm:$0xff] }
  0x1b   : > { %v2036_v6 = vpack.i.bf16 %v356_v5, %v355_v4  ;;  %v351_v7 = vld [vmem:[%s327_s22 + $0x30] sm:$0xff]  ;;  %v352_v8 = vld [vmem:[%s327_s22 + $0x38] sm:$0xff]  ;;  %v353_v12 = vld [vmem:[%s327_s22 + $0x40] sm:$0xff]  ;;  %v2031_v14 = vpack.i.bf16 %v358_v10, %v357_v9 }
  0x1c   : > { %2027 = vrot.lane.b32.xlu0 %v2026_v3, %s2133_s23  ;;  %v2046_v11 = vpack.i.bf16 %v352_v8, %v351_v7  ;;  %v354_v13 = vld [vmem:[%s327_s22 + $0x48] sm:$0xff]  ;;  %v349_v15 = vld [vmem:[%s327_s22 + $0x20] sm:$0xff]  ;;  %v347_v19 = vld [vmem:[%s327_s22 + $0x10] sm:$0xff] }
  0x1d   : > { %2037 = vrot.lane.b32.xlu1 %v2036_v6, %s2133_s23  ;;  %v350_v16 = vld [vmem:[%s327_s22 + $0x28] sm:$0xff]  ;;  %v2041_v17 = vpack.i.bf16 %v354_v13, %v353_v12  ;;  %v348_v20 = vld [vmem:[%s327_s22 + $0x18] sm:$0xff]  ;;  %v345_v21 = vld [vmem:[%s327_s22] sm:$0xff] }
  0x1e   : > { %2047 = vrot.lane.b32.xlu2 %v2046_v11, %s2133_s23  ;;  %v2051_v18 = vpack.i.bf16 %v350_v16, %v349_v15  ;;  %v346_v22 = vld [vmem:[%s327_s22 + $0x8] sm:$0xff]  ;;  %v2056_v23 = vpack.i.bf16 %v348_v20, %v347_v19  ;;  %v343_v35 = vld [vmem:[%s2263_s26 + $0x70] sm:$0xff]  ;;  %v344_v36 = vld [vmem:[%s2263_s26 + $0x78] sm:$0xff]  ;;  %s2085_s22 = scalar_lea.hbm %s2084_s21, 1 }
  0x1f   : > { %v2061_v24 = vpack.i.bf16 %v346_v22, %v345_v21  ;;  %v507_v45 = vld [vmem:[%s2978_s3 + $0xc8] sm:$0xff]  ;;  %v341_v47 = vld [vmem:[%s2263_s26 + $0x60] sm:$0xff]  ;;  %v339_v53 = vld [vmem:[%s2263_s26 + $0x50] sm:$0xff]  ;;  %p2086_p11 = scmp.ne.s32.totalorder %s2084_s21, %s2085_s22  ;;  %p2091_p1 = scmp.lt.s32.totalorder %s2089_s24, %s2085_s22 }
  0x20   : > { %v342_v48 = vld [vmem:[%s2263_s26 + $0x68] sm:$0xff]  ;;  %v340_v54 = vld [vmem:[%s2263_s26 + $0x58] sm:$0xff]  ;;  %v512_v62 = vld [vmem:[%s2978_s3 + $0xf0] sm:$0xff] }
  0x21   : > { %v488_v63 = vld [vmem:[%s2978_s3 + $0x30] sm:$0xff]  ;;  %v337_v4 = vld [vmem:[%s2263_s26 + $0x40] sm:$0xff]  ;;  %v338_v5 = vld [vmem:[%s2263_s26 + $0x48] sm:$0xff]  ;;  %p2087_p12 = pnand %p2086_p11, %p2221_p5  ;;  %p2092_p2 = por %p2091_p1, %p2090_p0 }
  0x22   : > { %v504_v0 = vld [vmem:[%s2978_s3 + $0xb0] sm:$0xff]  ;;  %v497_v10 = vld [vmem:[%s2978_s3 + $0x78] sm:$0xff]  ;;  %v503_v11 = vld [vmem:[%s2978_s3 + $0xa8] sm:$0xff] }
  0x23   : > { %v489_v12 = vld [vmem:[%s2978_s3 + $0x38] sm:$0xff]  ;;  %v335_v16 = vld [vmem:[%s2263_s26 + $0x30] sm:$0xff]  ;;  %v511_v22 = vld [vmem:[%s2978_s3 + $0xe8] sm:$0xff]  ;;  %p2088_p13 = pneg %p2087_p12 }
  0x24   : > { %2032 = vrot.lane.b32.xlu0 %v2031_v14, %s2133_s23 }
  0x25   : > { %2042 = vrot.lane.b32.xlu1 %v2041_v17, %s2133_s23  ;;  %v336_v17 = vld [vmem:[%s2263_s26 + $0x38] sm:$0xff]  ;;  %p2093_p3 = pnand %p2092_p2, %p2088_p13 }
  0x26   : > { %2052 = vrot.lane.b32.xlu2 %v2051_v18, %s2133_s23 }
  0x2c   : > { %2057 = vrot.lane.b32.xlu0 %v2056_v23, %s2133_s23  ;;  %v500_v23 = vld [vmem:[%s2978_s3 + $0x90] sm:$0xff] }
  0x2d   : > { %2062 = vrot.lane.b32.xlu1 %v2061_v24, %s2133_s23  ;;  %v486_v24 = vld [vmem:[%s2978_s3 + $0x20] sm:$0xff] }
  0x2e   : > { %666 = vperm.xlu2 %2066, %v512_v62   ;;  %v1913_v62 = vld [vmem:[%s2977_s2] sm:$0xff] }
  0x34   : > { %671 = vperm.xlu0 %2067, %v513_v26  }
  0x35   : > { %586 = vperm.xlu1 %2068, %v496_v27  }
  0x36   : > { %591 = vperm.xlu2 %2066, %v497_v10  }
  0x3c   : > { %576 = vperm.xlu0 %2067, %v494_v28   ;;  %v333_v28 = vld [vmem:[%s2263_s26 + $0x20] sm:$0xff] }
  0x3d   : > { %656 = vperm.xlu1 %2068, %v510_v29   ;;  %v334_v29 = vld [vmem:[%s2263_s26 + $0x28] sm:$0xff] }
  0x3e   : > { %661 = vperm.xlu2 %2066, %v511_v22   ;;  %v1024_v22 = vld [vmem:[%s2980_s5 + $0xe0] sm:$0xff] }
  0x44   : > { %651 = vperm.xlu0 %2067, %v509_v30  }
  0x45   : > { %581 = vperm.xlu1 %2068, %v495_v31  }
  0x4c   : > { %636 = vperm.xlu0 %2067, %v506_v32  }
  0x4d   : > { %566 = vperm.xlu1 %2068, %v492_v33  }
  0x54   : > { %561 = vperm.xlu0 %2067, %v491_v44  }
  0x55   : > { %641 = vperm.xlu1 %2068, %v507_v45   ;;  %v493_v45 = vld [vmem:[%s2978_s3 + $0x58] sm:$0xff] }
  0x5c   : > { %546 = vperm.xlu0 %2067, %v488_v63   ;;  %v502_v63 = vld [vmem:[%s2978_s3 + $0xa0] sm:$0xff] }
  0x5d   : > { %626 = vperm.xlu1 %2068, %v504_v0   ;;  %v1925_v0 = vld [vmem:[%s2977_s2 + $0x60] sm:$0xff] }
  0x64   : > { %621 = vperm.xlu0 %2067, %v503_v11   ;;  %v1006_v11 = vld [vmem:[%s2980_s5 + $0x50] sm:$0xff] }
  0x65   : > { %551 = vperm.xlu1 %2068, %v489_v12   ;;  %v1002_v12 = vld [vmem:[%s2980_s5 + $0x30] sm:$0xff] }
  0x6c   : > { %606 = vperm.xlu0 %2067, %v500_v23   ;;  %v1928_v23 = vld [vmem:[%s2977_s2 + $0x78] sm:$0xff] }
  0x6d   : > { %536 = vperm.xlu1 %2068, %v486_v24  }
  0x78   : > { %v2048_v7 = vpop.permute.xlu2 %2047 }
  0x79   : > { %v2050_v14 = vunpack.i.h.bf16 %v2048_v7  ;;  %v2049_v15 = vunpack.i.l.bf16 %v2048_v7  ;;  %v1007_v7 = vld [vmem:[%s2980_s5 + $0x58] sm:$0xff] }
  0x7b   : > { %v432_v19 = vsel %vm425_vm0, %v335_v16, %v2049_v15  ;;  %v433_v20 = vsel %vm425_vm0, %v336_v17, %v2050_v14  ;;  %v1010_v14 = vld [vmem:[%s2980_s5 + $0x70] sm:$0xff]  ;;  %v1005_v15 = vld [vmem:[%s2980_s5 + $0x48] sm:$0xff]  ;;  %v1027_v16 = vld [vmem:[%s2980_s5 + $0xf8] sm:$0xff] }
  0x7c   : > { %v445_v25 = vpack.c.bf16 %v433_v20, %v432_v19  ;;  %v1916_v20 = vld [vmem:[%s2977_s2 + $0x18] sm:$0xff] }
  0x7e   : > { %v813_v30 = vsel %vm754_vm1, %v445_v25, 0  ;;  %v1004_v25 = vld [vmem:[%s2980_s5 + $0x40] sm:$0xff] }
  0x80   : > { %v2053_v21 = vpop.permute.xlu2 %2052 }
  0x81   : > { %v2055_v26 = vunpack.i.h.bf16 %v2053_v21  ;;  %v2054_v27 = vunpack.i.l.bf16 %v2053_v21  ;;  %v1026_v21 = vld [vmem:[%s2980_s5 + $0xf0] sm:$0xff] }
  0x83   : > { %v430_v31 = vsel %vm425_vm0, %v333_v28, %v2054_v27  ;;  %v431_v32 = vsel %vm425_vm0, %v334_v29, %v2055_v26  ;;  %v1001_v27 = vld [vmem:[%s2980_s5 + $0x28] sm:$0xff]  ;;  %v999_v28 = vld [vmem:[%s2980_s5 + $0x18] sm:$0xff] }
  0x88   : > { %v2467_v29 = vpop.permute.xlu2 %666 }
  0x8e   : > { %v2028_v34 = vpop.permute.xlu0 %2027 }
  0x8f   : > { %v2030_v37 = vunpack.i.h.bf16 %v2028_v34  ;;  %v2029_v38 = vunpack.i.l.bf16 %v2028_v34  ;;  %v2038_v42 = vpop.permute.xlu1 %2037  ;;  %v508_v34 = vld [vmem:[%s2978_s3 + $0xd0] sm:$0xff] }
  0x90   : > { %v2040_v51 = vunpack.i.h.bf16 %v2038_v42  ;;  %v2039_v52 = vunpack.i.l.bf16 %v2038_v42  ;;  %646 = vperm.xlu2 %2066, %v508_v34   ;;  %v998_v34 = vld [vmem:[%s2980_s5 + $0x10] sm:$0xff] }
  0x91   : > { %v440_v39 = vsel %vm425_vm0, %v343_v35, %v2029_v38  ;;  %v441_v40 = vsel %vm425_vm0, %v344_v36, %v2030_v37  ;;  %v485_v35 = vld [vmem:[%s2978_s3 + $0x18] sm:$0xff]  ;;  %v444_v37 = vpack.c.bf16 %v431_v32, %v430_v31  ;;  %v1917_v32 = vld [vmem:[%s2977_s2 + $0x20] sm:$0xff] }
  0x92   : > { %v449_v41 = vpack.c.bf16 %v441_v40, %v440_v39  ;;  %v436_v58 = vsel %vm425_vm0, %v339_v53, %v2039_v52  ;;  %v437_v59 = vsel %vm425_vm0, %v340_v54, %v2040_v51  ;;  %v501_v36 = vld [vmem:[%s2978_s3 + $0x98] sm:$0xff]  ;;  %531 = vperm.xlu0 %2067, %v485_v35   ;;  %v331_v40 = vld [vmem:[%s2263_s26 + $0x10] sm:$0xff]  ;;  %v329_v52 = vld [vmem:[%s2263_s26] sm:$0xff] }
  0x93   : > { %v447_v1 = vpack.c.bf16 %v437_v59, %v436_v58  ;;  %611 = vperm.xlu1 %2068, %v501_v36   ;;  %v810_v42 = vsel %vm754_vm1, %v444_v37, 0  ;;  %v330_v53 = vld [vmem:[%s2263_s26 + $0x8] sm:$0xff]  ;;  %v996_v35 = vld [vmem:[%s2980_s5] sm:$0xff]  ;;  %v2489_v37 = vpop.permute.xlu2 %591 }
  0x94   : > { %v825_v43 = vsel %vm754_vm1, %v449_v41, 0  ;;  %v332_v41 = vld [vmem:[%s2263_s26 + $0x18] sm:$0xff]  ;;  %v483_v58 = vld [vmem:[%s2978_s3 + $0x8] sm:$0xff]  ;;  %v1000_v36 = vld [vmem:[%s2980_s5 + $0x20] sm:$0xff] }
  0x95   : > { %827 = vmatpush.bf16.xpose.msra.mxu0 %v825_v43  ;;  %1961 = vmatpush.bf16.xpose.msra.mxu3 %v825_v43  ;;  %v819_v6 = vsel %vm754_vm1, %v447_v1, 0  ;;  %v487_v1 = vld [vmem:[%s2978_s3 + $0x28] sm:$0xff] }
  0x96   : > { %v2033_v46 = vpop.permute.xlu0 %2032 }
  0x97   : > { %v2035_v49 = vunpack.i.h.bf16 %v2033_v46  ;;  %v2034_v50 = vunpack.i.l.bf16 %v2033_v46  ;;  %v2043_v61 = vpop.permute.xlu1 %2042 }
  0x98   : > { %v2045_v2 = vunpack.i.h.bf16 %v2043_v61  ;;  %v2044_v3 = vunpack.i.l.bf16 %v2043_v61  ;;  %571 = vperm.xlu2 %2066, %v493_v45   ;;  %v505_v61 = vld [vmem:[%s2978_s3 + $0xb8] sm:$0xff] }
  0x99   : > { %v438_v55 = vsel %vm425_vm0, %v341_v47, %v2034_v50  ;;  %v439_v56 = vsel %vm425_vm0, %v342_v48, %v2035_v49  ;;  %v482_v47 = vld [vmem:[%s2978_s3] sm:$0xff] }
  0x9a   : > { %v448_v57 = vpack.c.bf16 %v439_v56, %v438_v55  ;;  %v434_v8 = vsel %vm425_vm0, %v337_v4, %v2044_v3  ;;  %v435_v9 = vsel %vm425_vm0, %v338_v5, %v2045_v2  ;;  %v498_v48 = vld [vmem:[%s2978_s3 + $0x80] sm:$0xff]  ;;  %516 = vperm.xlu0 %2067, %v482_v47   ;;  %v1914_v2 = vld [vmem:[%s2977_s2 + $0x8] sm:$0xff]  ;;  %v484_v3 = vld [vmem:[%s2978_s3 + $0x10] sm:$0xff] }
  0x9b   : > { %v446_v13 = vpack.c.bf16 %v435_v9, %v434_v8  ;;  %596 = vperm.xlu1 %2068, %v498_v48   ;;  %v1008_v4 = vld [vmem:[%s2980_s5 + $0x60] sm:$0xff]  ;;  %v1926_v5 = vld [vmem:[%s2977_s2 + $0x68] sm:$0xff]  ;;  %v1915_v9 = vld [vmem:[%s2977_s2 + $0x10] sm:$0xff] }
  0x9c   : > { %v822_v60 = vsel %vm754_vm1, %v448_v57, 0  ;;  %v490_v57 = vld [vmem:[%s2978_s3 + $0x40] sm:$0xff]  ;;  %v499_v8 = vld [vmem:[%s2978_s3 + $0x88] sm:$0xff]  ;;  %v1022_v48 = vld [vmem:[%s2980_s5 + $0xd0] sm:$0xff] }
  0x9d   : > { %828 = vmatpush.bf16.xpose.msra.mxu0 %v822_v60  ;;  %1962 = vmatpush.bf16.xpose.msra.mxu3 %v822_v60  ;;  %v816_v18 = vsel %vm754_vm1, %v446_v13, 0  ;;  %v1927_v13 = vld [vmem:[%s2977_s2 + $0x70] sm:$0xff]  ;;  %v1016_v47 = vld [vmem:[%s2980_s5 + $0xa0] sm:$0xff] }
  0x9e   : > { %v2058_v33 = vpop.permute.xlu0 %2057 }
  0x9f   : > { %v2060_v38 = vunpack.i.h.bf16 %v2058_v33  ;;  %v2059_v39 = vunpack.i.l.bf16 %v2058_v33  ;;  %v2063_v46 = vpop.permute.xlu1 %2062 }
  0xa0   : > { %v2065_v50 = vunpack.i.h.bf16 %v2063_v46  ;;  %v2064_v51 = vunpack.i.l.bf16 %v2063_v46  ;;  %556 = vperm.xlu2 %2066, %v490_v57   ;;  %v1020_v46 = vld [vmem:[%s2980_s5 + $0xc0] sm:$0xff] }
  0xa1   : > { %v428_v43 = vsel %vm425_vm0, %v331_v40, %v2059_v39  ;;  %v429_v44 = vsel %vm425_vm0, %v332_v41, %v2060_v38  ;;  %v1023_v39 = vld [vmem:[%s2980_s5 + $0xd8] sm:$0xff]  ;;  %v1021_v40 = vld [vmem:[%s2980_s5 + $0xc8] sm:$0xff] }
  0xa2   : > { %v443_v49 = vpack.c.bf16 %v429_v44, %v428_v43  ;;  %v426_v55 = vsel %vm425_vm0, %v329_v52, %v2064_v51  ;;  %v427_v56 = vsel %vm425_vm0, %v330_v53, %v2065_v50  ;;  %v2504_v43 = vpop.permute.xlu2 %661  ;;  %v1918_v44 = vld [vmem:[%s2977_s2 + $0x28] sm:$0xff]  ;;  %v1019_v51 = vld [vmem:[%s2980_s5 + $0xb8] sm:$0xff] }
  0xa3   : > { %v442_v59 = vpack.c.bf16 %v427_v56, %v426_v55  ;;  %521 = vperm.xlu1 %2068, %v483_v58   ;;  %v1015_v52 = vld [vmem:[%s2980_s5 + $0x98] sm:$0xff]  ;;  %v1919_v55 = vld [vmem:[%s2977_s2 + $0x30] sm:$0xff]  ;;  %v997_v56 = vld [vmem:[%s2980_s5 + $0x8] sm:$0xff] }
  0xa4   : > { %v807_v54 = vsel %vm754_vm1, %v443_v49, 0  ;;  %v1014_v58 = vld [vmem:[%s2980_s5 + $0x90] sm:$0xff] }
  0xa5   : > { %829 = vmatpush.bf16.xpose.msra.mxu0 %v819_v6  ;;  %1963 = vmatpush.bf16.xpose.msra.mxu3 %v819_v6  ;;  %v804_v60 = vsel %vm754_vm1, %v442_v59, 0  ;;  %v1011_v6 = vld [vmem:[%s2980_s5 + $0x78] sm:$0xff]  ;;  %v1575_v59 = vld [vmem:[#allocation2] sm:$0x1] }
  0xa6   : > { %1105 = vperm.xlu0 %2067, %v1011_v6   ;;  %v2433_v17 = vpop.permute.xlu0 %671  ;;  %v1012_v6 = vld [vmem:[%s2980_s5 + $0x80] sm:$0xff] }
  0xa7   : > { %v2411_v10 = vpop.permute.xlu1 %586 }
  0xa8   : > { %631 = vperm.xlu2 %2066, %v505_v61  }
  0xab   : > { %1090 = vperm.xlu1 %2068, %v1008_v4  }
  0xad   : > { %830 = vmatpush.bf16.xpose.msra.mxu0 %v816_v18  ;;  %1964 = vmatpush.bf16.xpose.msra.mxu3 %v816_v18  ;;  %v1009_v18 = vld [vmem:[%s2980_s5 + $0x68] sm:$0xff] }
  0xae   : > { %1080 = vperm.xlu0 %2067, %v1006_v11   ;;  %v2453_v24 = vpop.permute.xlu0 %576 }
  0xaf   : > { %v2438_v19 = vpop.permute.xlu1 %656 }
  0xb0   : > { %616 = vperm.xlu2 %2066, %v502_v63   ;;  %v1013_v63 = vld [vmem:[%s2980_s5 + $0x88] sm:$0xff] }
  0xb3   : > { %1085 = vperm.xlu1 %2068, %v1007_v7  }
  0xb5   : > { %831 = vmatpush.bf16.xpose.msra.mxu0 %v813_v30  ;;  %1965 = vmatpush.bf16.xpose.msra.mxu3 %v813_v30  ;;  %v1003_v30 = vld [vmem:[%s2980_s5 + $0x38] sm:$0xff] }
  0xb6   : > { %1075 = vperm.xlu0 %2067, %v1005_v15   ;;  %v2472_v31 = vpop.permute.xlu0 %651 }
  0xb7   : > { %v2459_v26 = vpop.permute.xlu1 %581 }
  0xb8   : > { %541 = vperm.xlu2 %2066, %v487_v1   ;;  %v1920_v1 = vld [vmem:[%s2977_s2 + $0x38] sm:$0xff] }
  0xbb   : > { %1060 = vperm.xlu1 %2068, %v1002_v12  }
  0xbd   : > { %832 = vmatpush.bf16.xpose.msra.mxu0 %v810_v42  ;;  %1966 = vmatpush.bf16.xpose.msra.mxu3 %v810_v42  ;;  %v1025_v42 = vld [vmem:[%s2980_s5 + $0xe8] sm:$0xff] }
  0xbe   : > { %1180 = vperm.xlu0 %2067, %v1026_v21   ;;  %v2491_v38 = vpop.permute.xlu0 %636 }
  0xbf   : > { %v2477_v33 = vpop.permute.xlu1 %566 }
  0xc0   : > { %526 = vperm.xlu2 %2066, %v484_v3   ;;  %v1017_v3 = vld [vmem:[%s2980_s5 + $0xa8] sm:$0xff] }
  0xc3   : > { %1185 = vperm.xlu1 %2068, %v1027_v16  }
  0xc5   : > { %833 = vmatpush.bf16.xpose.msra.mxu0 %v807_v54  ;;  %1967 = vmatpush.bf16.xpose.msra.mxu3 %v807_v54 }
  0xc6   : > { %1055 = vperm.xlu0 %2067, %v1001_v27   ;;  %v2509_v45 = vpop.permute.xlu0 %561  ;;  %v1922_v27 = vld [vmem:[%s2977_s2 + $0x48] sm:$0xff] }
  0xc7   : > { %v2499_v41 = vpop.permute.xlu1 %641 }
  0xc8   : > { %601 = vperm.xlu2 %2066, %v499_v8  }
  0xcb   : > { %1170 = vperm.xlu1 %2068, %v1024_v22  }
  0xcd   : > { %834 = vmatpush.bf16.xpose.msra.mxu0 %v804_v60  ;;  %1968 = vmatpush.bf16.xpose.msra.mxu3 %v804_v60 }
  0xce   : > { %1040 = vperm.xlu0 %2067, %v998_v34   ;;  %v2531_v53 = vpop.permute.xlu0 %546 }
  0xcf   : > { %v2521_v49 = vpop.permute.xlu1 %626 }
  0xd0   : > { %1100 = vperm.xlu2 %2066, %v1010_v14  }
  0xd3   : > { %1045 = vperm.xlu1 %2068, %v999_v28  }
  0xd4   : > { %1767 = vmatmul.msk.bf16.vlgmr.msra.gmra.mxu0 %vm754_vm1, %v1913_v62  ;;  %1779 = vmatmul.msk.bf16.vlgmr.msra.gmra.mxu3 %vm754_vm1, %v1925_v0  ;;  %v1018_v62 = vld [vmem:[%s2980_s5 + $0xb0] sm:$0xff] }
  0xd6   : > { %1165 = vperm.xlu0 %2067, %v1023_v39   ;;  %v2547_v60 = vpop.permute.xlu0 %621 }
  0xd7   : > { %v2533_v54 = vpop.permute.xlu1 %551 }
  0xd8   : > { %1095 = vperm.xlu2 %2066, %v1009_v18  }
  0xdb   : > { %1030 = vperm.xlu1 %2068, %v996_v35  }
  0xde   : > { %1150 = vperm.xlu0 %2067, %v1020_v46   ;;  %v1923_v46 = vld [vmem:[%s2977_s2 + $0x50] sm:$0xff] }
  0xdf   : > { %v537_v61 = vpop.permute.xlu1 %536 }
  0xe0   : > { %1070 = vperm.xlu2 %2066, %v1004_v25  }
  0xe3   : > { %1155 = vperm.xlu1 %2068, %v1021_v40  }
  0xe4   : > { %1768 = vmatmul.msk.bf16.gmra.mxu0 %vm754_vm1, %v1914_v2  ;;  %1780 = vmatmul.msk.bf16.gmra.mxu3 %vm754_vm1, %v1926_v5  ;;  %v2560_v2 = vpop.permute.xlu0 %606 }
  0xe6   : > { %1145 = vperm.xlu0 %2067, %v1019_v51  }
  0xe8   : > { %1065 = vperm.xlu2 %2066, %v1003_v30  }
  0xea   : > { %v2523_v50 = vpop.permute.xlu2 %646 }
  0xeb   : > { %1130 = vperm.xlu1 %2068, %v1016_v47  }
  0xee   : > { %1120 = vperm.xlu0 %2067, %v1014_v58  }
  0xf0   : > { %1050 = vperm.xlu2 %2066, %v1000_v36  }
  0xf2   : > { %v2541_v57 = vpop.permute.xlu2 %571 }
  0xf3   : > { %1125 = vperm.xlu1 %2068, %v1015_v52  }
  0xf4   : > { %1769 = vmatmul.msk.bf16.gmra.mxu0 %vm754_vm1, %v1915_v9  ;;  %1781 = vmatmul.msk.bf16.gmra.mxu3 %vm754_vm1, %v1927_v13  ;;  %v1921_v9 = vld [vmem:[%s2977_s2 + $0x40] sm:$0xff] }
  0xf6   : > { %1115 = vperm.xlu0 %2067, %v1013_v63   ;;  %v1924_v63 = vld [vmem:[%s2977_s2 + $0x58] sm:$0xff] }
  0xf8   : > { %1175 = vperm.xlu2 %2066, %v1025_v42  }
  0xfa   : > { %v2555_v0 = vpop.permute.xlu2 %556 }
  0xfb   : > { %1578 = vperm.xlu1 %2068, %v1575_v59  }
 0x100   : > { %1160 = vperm.xlu2 %2066, %v1022_v48  }
 0x102   : > { %v2568_v5 = vpop.permute.xlu2 %631 }
 0x104   : > { %1770 = vmatmul.msk.bf16.gmra.mxu0 %vm754_vm1, %v1916_v20  ;;  %1782 = vmatmul.msk.bf16.gmra.mxu3 %vm754_vm1, %v1928_v23  ;;  %v532_v7 = vpop.permute.xlu0 %531 }
 0x105   : > { %v2565_v4 = vpop.permute.xlu1 %611 }
 0x108   : > { %1035 = vperm.xlu2 %2066, %v997_v56  }
 0x10a   : > { %v2578_v11 = vpop.permute.xlu2 %616 }
 0x10c   : > { %v517_v13 = vpop.permute.xlu0 %516 }
 0x10d   : > { %v2573_v8 = vpop.permute.xlu1 %596 }
 0x110   : > { %1140 = vperm.xlu2 %2066, %v1018_v62  }
 0x112   : > { %v542_v20 = vpop.permute.xlu2 %541 }
 0x114   : > { %1771 = vmatmul.msk.bf16.gmra.mxu0 %vm754_vm1, %v1917_v32 }
 0x115   : > { %v522_v14 = vpop.permute.xlu1 %521 }
 0x118   : > { %1135 = vperm.xlu2 %2066, %v1017_v3  }
 0x11a   : > { %v527_v32 = vpop.permute.xlu2 %526 }
 0x120   : > { %1110 = vperm.xlu2 %2066, %v1012_v6  }
 0x124   : > { %1772 = vmatmul.msk.bf16.gmra.mxu0 %vm754_vm1, %v1918_v44 }
 0x134   : > { %1773 = vmatmul.msk.bf16.gmra.mxu0 %vm754_vm1, %v1919_v55 }
 0x144   : > { %1774 = vmatmul.msk.bf16.gmra.mxu0 %vm754_vm1, %v1920_v1 }
 0x151   : > { %v836_v12 = vpop.f32.mrf.mxu0 }
 0x152   : > { %v837_v15 = vadd.f32 %v836_v12, %v517_v13 }
 0x154   : > { %1775 = vmatmul.msk.bf16.gmra.mxu0 %vm754_vm1, %v1921_v9  ;;  %v916_v21 = vmax.f32 %v837_v15, 0.0 }
 0x157   : > { %v896_v23 = vpop.f32.mrf.mxu3 }
 0x159   : > { %v838_v16 = vpop.f32.mrf.mxu0 }
 0x15a   : > { %v839_v18 = vadd.f32 %v838_v16, %v522_v14 }
 0x15c   : > { %v917_v22 = vmax.f32 %v839_v18, 0.0 }
 0x15e   : > { %v2581_v25 = vpack.c.bf16 %v917_v22, %v916_v21 }
 0x15f   : > { %v898_v30 = vpop.f32.mrf.mxu3 }
 0x161   : > { %v841_v28 = vpop.f32.mrf.mxu0 }
 0x162   : > { %v842_v34 = vadd.f32 %v841_v28, %v527_v32 }
 0x164   : > { %1776 = vmatmul.msk.bf16.gmra.mxu0 %vm754_vm1, %v1922_v27  ;;  %v918_v39 = vmax.f32 %v842_v34, 0.0 }
 0x167   : > { %v901_v42 = vpop.f32.mrf.mxu3 }
 0x168   : > { %v902_v34 = vadd.f32 %v901_v42, %v2523_v50 }
 0x169   : > { %v843_v35 = vpop.f32.mrf.mxu0 }
 0x16a   : > { %v844_v36 = vadd.f32 %v843_v35, %v532_v7 }
 0x16c   : > { %v919_v40 = vmax.f32 %v844_v36, 0.0 }
 0x16e   : > { %v2587_v44 = vpack.c.bf16 %v919_v40, %v918_v39 }
 0x16f   : > { %v903_v48 = vpop.f32.mrf.mxu3 }
 0x170   : > { %v904_v35 = vadd.f32 %v903_v48, %v2472_v31 }
 0x171   : > { %v846_v47 = vpop.f32.mrf.mxu0 }
 0x172   : > { %v847_v51 = vadd.f32 %v846_v47, %v537_v61  ;;  %v943_v39 = vmax.f32 %v904_v35, 0.0  ;;  %v1801_v35 = vld [vmem:[%s2979_s4 + $0x20] sm:$0xf] }
 0x174   : > { %1777 = vmatmul.msk.bf16.gmra.mxu0 %vm754_vm1, %v1923_v46  ;;  %v920_v56 = vmax.f32 %v847_v51, 0.0 }
 0x177   : > { %v906_v59 = vpop.f32.mrf.mxu3 }
 0x178   : > { %v907_v18 = vadd.f32 %v906_v59, %v2438_v19  ;;  %v899_v19 = vadd.f32 %v898_v30, %v2499_v41 }
 0x179   : > { %v848_v52 = vpop.f32.mrf.mxu0 }
 0x17a   : > { %v849_v55 = vadd.f32 %v848_v52, %v542_v20  ;;  %v944_v28 = vmax.f32 %v907_v18, 0.0  ;;  %v941_v46 = vmax.f32 %v899_v19, 0.0 }
 0x17c   : > { %v921_v58 = vmax.f32 %v849_v55, 0.0 }
 0x17e   : > { %v2593_v62 = vpack.c.bf16 %v921_v58, %v920_v56 }
 0x17f   : > { %v908_v3 = vpop.f32.mrf.mxu3 }
 0x180   : > { %v909_v20 = vadd.f32 %v908_v3, %v2504_v43 }
 0x181   : > { %v851_v1 = vpop.f32.mrf.mxu0 }
 0x182   : > { %v852_v6 = vadd.f32 %v851_v1, %v2531_v53  ;;  %v945_v32 = vmax.f32 %v909_v20, 0.0 }
 0x184   : > { %1778 = vmatmul.msk.bf16.gmra.mxu0 %vm754_vm1, %v1924_v63  ;;  %v922_v9 = vmax.f32 %v852_v6, 0.0  ;;  %v2614_v43 = vpack.c.bf16 %v945_v32, %v944_v28 }
 0x187   : > { %v911_v13 = vpop.f32.mrf.mxu3 }
 0x188   : > { %v912_v16 = vadd.f32 %v911_v13, %v2467_v29  ;;  %v897_v29 = vadd.f32 %v896_v23, %v2491_v38 }
 0x189   : > { %v853_v7 = vpop.f32.mrf.mxu0 }
 0x18a   : > { %v854_v61 = vadd.f32 %v853_v7, %v2533_v54  ;;  %v946_v27 = vmax.f32 %v912_v16, 0.0  ;;  %v940_v40 = vmax.f32 %v897_v29, 0.0 }
 0x18c   : > { %v923_v12 = vmax.f32 %v854_v61, 0.0  ;;  %v2617_v31 = vpack.c.bf16 %v941_v46, %v940_v40 }
 0x18e   : > { %v2601_v14 = vpack.c.bf16 %v923_v12, %v922_v9 }
 0x18f   : > { %v913_v21 = vpop.f32.mrf.mxu3 }
 0x190   : > { %v914_v22 = vadd.f32 %v913_v21, %v2433_v17  ;;  %v942_v17 = vmax.f32 %v902_v34, 0.0  ;;  %v1793_v21 = vld [vmem:[%s2979_s4 + $0x10] sm:$0xf] }
 0x191   : > { %v856_v15 = vpop.f32.mrf.mxu0 }
 0x192   : > { %v947_v53 = vmax.f32 %v914_v22, 0.0  ;;  %v993_v50 = vpack.c.bf16 %v943_v39, %v942_v17  ;;  %v1932_v22 = vld [vmem:[%s2979_s4 + $0x14] sm:$0xf0] }
 0x193   : > { %v1794_v28 = vor.u32 %v1932_v22, %v1793_v21  ;;  %v1944_v21 = vld [vmem:[%s2979_s4 + $0x74] sm:$0xf0]  ;;  %v1937_v22 = vld [vmem:[%s2979_s4 + $0x44] sm:$0xf] }
 0x194   : > { %v2609_v36 = vpack.c.bf16 %v947_v53, %v946_v27  ;;  %v1960_v27 = vld [vmem:[%s2979_s4 + $0xf4] sm:$0xf0] }
 0x196   : > { %1437 = vmatpush.bf16.msra.mxu2 %v2609_v36 }
 0x199   : > { %v858_v54 = vpop.f32.mrf.mxu0 }
 0x19a   : > { %1438 = vmatpush.bf16.msra.mxu2 %v2614_v43 }
 0x19e   : > { %1439 = vmatpush.bf16.msra.mxu2 %v993_v50 }
 0x1a1   : > { %v861_v47 = vpop.f32.mrf.mxu0 }
 0x1a2   : > { %1440 = vmatpush.bf16.msra.mxu2 %v2617_v31  ;;  %v862_v3 = vadd.f32 %v861_v47, %v2477_v33 }
 0x1a9   : > { %v863_v38 = vpop.f32.mrf.mxu0 }
 0x1aa   : > { %v864_v59 = vadd.f32 %v863_v38, %v2541_v57 }
 0x1b1   : > { %v866_v23 = vpop.f32.mrf.mxu0 }
 0x1b2   : > { %v867_v55 = vadd.f32 %v866_v23, %v2453_v24  ;;  %v926_v24 = vmax.f32 %v862_v3, 0.0  ;;  %v602_v23 = vpop.permute.xlu2 %601  ;;  %v1817_v3 = vld [vmem:[%s2979_s4 + $0x40] sm:$0xf] }
 0x1b4   : > { %v928_v6 = vmax.f32 %v867_v55, 0.0  ;;  %v1957_v55 = vld [vmem:[%s2979_s4 + $0xe4] sm:$0xf] }
 0x1b9   : > { %v868_v41 = vpop.f32.mrf.mxu0 }
 0x1ba   : > { %v869_v51 = vadd.f32 %v868_v41, %v2459_v26  ;;  %v927_v26 = vmax.f32 %v864_v59, 0.0 }
 0x1bc   : > { %v929_v63 = vmax.f32 %v869_v51, 0.0  ;;  %v985_v57 = vpack.c.bf16 %v927_v26, %v926_v24  ;;  %v1936_v51 = vld [vmem:[%s2979_s4 + $0x34] sm:$0xf0]  ;;  %v1959_v26 = vld [vmem:[%s2979_s4 + $0xf4] sm:$0xf] }
 0x1be   : > { %v986_v61 = vpack.c.bf16 %v929_v63, %v928_v6  ;;  %v1938_v6 = vld [vmem:[%s2979_s4 + $0x44] sm:$0xf0] }
 0x1c1   : > { %v871_v30 = vpop.f32.mrf.mxu0 }
 0x1c2   : > { %v872_v42 = vadd.f32 %v871_v30, %v2411_v10  ;;  %v859_v10 = vadd.f32 %v858_v54, %v2509_v45 }
 0x1c4   : > { %v930_v56 = vmax.f32 %v872_v42, 0.0  ;;  %v925_v9 = vmax.f32 %v859_v10, 0.0  ;;  %v1795_v10 = vld [vmem:[%s2979_s4 + $0x18] sm:$0xf0] }
 0x1c9   : > { %v873_v48 = vpop.f32.mrf.mxu0 }
 0x1ca   : > { %v874_v52 = vadd.f32 %v873_v48, %v2489_v37  ;;  %v857_v37 = vadd.f32 %v856_v15, %v2555_v0  ;;  %v1785_v0 = vld [vmem:[%s2979_s4] sm:$0xf]  ;;  %v1930_v15 = vld [vmem:[%s2979_s4 + $0x4] sm:$0xf0] }
 0x1cb   : > { %v1786_v18 = vor.u32 %v1930_v15, %v1785_v0  ;;  %v1833_v15 = vld [vmem:[%s2979_s4 + $0x60] sm:$0xf] }
 0x1cc   : > { %v931_v58 = vmax.f32 %v874_v52, 0.0  ;;  %v924_v12 = vmax.f32 %v857_v37, 0.0  ;;  %v1787_v52 = vld [vmem:[%s2979_s4 + $0x8] sm:$0xf0]  ;;  %v1818_v37 = vor.u32 %v1938_v6, %v1817_v3  ;;  %v1873_v6 = vld [vmem:[%s2979_s4 + $0xb0] sm:$0xf] }
 0x1ce   : > { %v987_v1 = vpack.c.bf16 %v931_v58, %v930_v56  ;;  %v984_v13 = vpack.c.bf16 %v925_v9, %v924_v12  ;;  %v1899_v56 = vld [vmem:[%s2979_s4 + $0xe8] sm:$0xf0]  ;;  %v1940_v12 = vld [vmem:[%s2979_s4 + $0x54] sm:$0xf0] }
 0x1d0   : > { %1348 = vmatpush.bf16.msra.mxu1 %v987_v1  ;;  %1969 = vmatpush.bf16.msrb.mxu3 %v987_v1  ;;  %v1902_v1 = vor.u32 %v1957_v55, %v1899_v56 }
 0x1d1   : > { %v2626_v7 = vpop.f32.mrf.mxu0 }
 0x1d4   : > { %1349 = vmatpush.bf16.msra.mxu1 %v986_v61  ;;  %1970 = vmatpush.bf16.msrb.mxu3 %v986_v61  ;;  %v1907_v61 = vld [vmem:[%s2979_s4 + $0xf8] sm:$0xf0] }
 0x1d5   : > { %v1910_v9 = vor.u32 %v1959_v26, %v1907_v61  ;;  %v1851_v26 = vld [vmem:[%s2979_s4 + $0x88] sm:$0xf0] }
 0x1d8   : > { %1350 = vmatpush.bf16.msra.mxu1 %v985_v57  ;;  %1971 = vmatpush.bf16.msrb.mxu3 %v985_v57  ;;  %v1825_v57 = vld [vmem:[%s2979_s4 + $0x50] sm:$0xf] }
 0x1d9   : > { %v878_v33 = vpop.f32.mrf.mxu0 }
 0x1da   : > { %v879_v41 = vadd.f32 %v878_v33, %v602_v23  ;;  %v1933_v33 = vld [vmem:[%s2979_s4 + $0x24] sm:$0xf] }
 0x1dc   : > { %1351 = vmatpush.bf16.msra.mxu1 %v984_v13  ;;  %1972 = vmatpush.bf16.msrb.mxu3 %v984_v13  ;;  %v933_v42 = vmax.f32 %v879_v41, 0.0  ;;  %v1803_v13 = vld [vmem:[%s2979_s4 + $0x28] sm:$0xf0] }
 0x1dd   : > { %v1806_v0 = vor.u32 %v1933_v33, %v1803_v13 }
 0x1e0   : > { %1352 = vmatpush.bf16.msra.mxu1 %v2601_v14  ;;  %1973 = vmatpush.bf16.msrb.mxu3 %v2601_v14  ;;  %v1897_v14 = vld [vmem:[%s2979_s4 + $0xe0] sm:$0xf] }
 0x1e1   : > { %v881_v45 = vpop.f32.mrf.mxu0 }
 0x1e4   : > { %1353 = vmatpush.bf16.msra.mxu1 %v2593_v62  ;;  %1974 = vmatpush.bf16.msrb.mxu3 %v2593_v62  ;;  %v1958_v62 = vld [vmem:[%s2979_s4 + $0xe4] sm:$0xf0] }
 0x1e5   : > { %v1898_v20 = vor.u32 %v1958_v62, %v1897_v14  ;;  %v1942_v14 = vld [vmem:[%s2979_s4 + $0x64] sm:$0xf0]  ;;  %v1935_v62 = vld [vmem:[%s2979_s4 + $0x34] sm:$0xf] }
 0x1e8   : > { %1354 = vmatpush.bf16.msra.mxu1 %v2587_v44  ;;  %1975 = vmatpush.bf16.msrb.mxu3 %v2587_v44 }
 0x1e9   : > { %v883_v16 = vpop.f32.mrf.mxu0 }
 0x1ec   : > { %1355 = vmatpush.bf16.msra.mxu1 %v2581_v25  ;;  %1976 = vmatpush.bf16.msrb.mxu3 %v2581_v25  ;;  %v1905_v25 = vld [vmem:[%s2979_s4 + $0xf0] sm:$0xf] }
 0x1ed   : > { %v1906_v32 = vor.u32 %v1960_v27, %v1905_v25  ;;  %v1819_v25 = vld [vmem:[%s2979_s4 + $0x48] sm:$0xf0] }
 0x1ef   : > { %1356 = vmatmul.bf16.vlgmr.msra.gmra.mxu1 %v1786_v18  ;;  %1426 = vmatmul.bf16.vlgmr.msrb.gmra.mxu3 %v1898_v20  ;;  %v1834_v18 = vor.u32 %v1942_v14, %v1833_v15  ;;  %v1881_v14 = vld [vmem:[%s2979_s4 + $0xc0] sm:$0xf] }
 0x1f0   : > { %1977 = vmatpush.bf16.msra.mxu3 %v2609_v36  ;;  %v1934_v36 = vld [vmem:[%s2979_s4 + $0x24] sm:$0xf0] }
 0x1f1   : > { %v886_v44 = vpop.f32.mrf.mxu0  ;;  %v1802_v17 = vor.u32 %v1934_v36, %v1801_v35  ;;  %v1939_v35 = vld [vmem:[%s2979_s4 + $0x54] sm:$0xf]  ;;  %v1827_v36 = vld [vmem:[%s2979_s4 + $0x58] sm:$0xf0] }
 0x1f2   : > { %v887_v39 = vadd.f32 %v886_v44, %v2578_v11  ;;  %v1841_v44 = vld [vmem:[%s2979_s4 + $0x70] sm:$0xf] }
 0x1f3   : > { %v1842_v27 = vor.u32 %v1944_v21, %v1841_v44 }
 0x1f4   : > { %1978 = vmatpush.bf16.msra.mxu3 %v2614_v43  ;;  %v936_v38 = vmax.f32 %v887_v39, 0.0 }
 0x1f8   : > { %1979 = vmatpush.bf16.msra.mxu3 %v993_v50 }
 0x1f9   : > { %v888_v53 = vpop.f32.mrf.mxu0 }
 0x1fa   : > { %v889_v19 = vadd.f32 %v888_v53, %v2547_v60  ;;  %v1822_v53 = vor.u32 %v1937_v22, %v1819_v25 }
 0x1fc   : > { %1980 = vmatpush.bf16.msra.mxu3 %v2617_v31  ;;  %v937_v47 = vmax.f32 %v889_v19, 0.0  ;;  %v882_v31 = vadd.f32 %v881_v45, %v2560_v2  ;;  %v1809_v2 = vld [vmem:[%s2979_s4 + $0x30] sm:$0xf]  ;;  %v1826_v45 = vor.u32 %v1940_v12, %v1825_v57  ;;  %v1830_v19 = vor.u32 %v1939_v35, %v1827_v36 }
 0x1fd   : > { %v1810_v59 = vor.u32 %v1936_v51, %v1809_v2  ;;  %v1950_v2 = vld [vmem:[%s2979_s4 + $0xa4] sm:$0xf0]  ;;  %v1943_v51 = vld [vmem:[%s2979_s4 + $0x74] sm:$0xf] }
 0x1fe   : > { %v990_v30 = vpack.c.bf16 %v937_v47, %v936_v38  ;;  %v934_v11 = vmax.f32 %v882_v31, 0.0  ;;  %v1941_v31 = vld [vmem:[%s2979_s4 + $0x64] sm:$0xf]  ;;  %v1835_v38 = vld [vmem:[%s2979_s4 + $0x68] sm:$0xf0] }
 0x1ff   : > { %1361 = vmatmul.bf16.gmra.mxu1 %v1794_v28  ;;  %1431 = vmatmul.bf16.gmra.mxu3 %v1906_v32  ;;  %v2751_v28 = vpop.permute.xlu2 %1100  ;;  %v2753_v32 = vpop.permute.xlu1 %1090  ;;  %v1838_v41 = vor.u32 %v1941_v31, %v1835_v38  ;;  %v1949_v31 = vld [vmem:[%s2979_s4 + $0xa4] sm:$0xf]  ;;  %v1867_v38 = vld [vmem:[%s2979_s4 + $0xa8] sm:$0xf0] }
 0x201   : > { %v891_v54 = vpop.f32.mrf.mxu0 }
 0x202   : > { %v892_v34 = vadd.f32 %v891_v54, %v2521_v49  ;;  %v884_v49 = vadd.f32 %v883_v16, %v2565_v4  ;;  %v1811_v16 = vld [vmem:[%s2979_s4 + $0x38] sm:$0xf0]  ;;  %v1849_v54 = vld [vmem:[%s2979_s4 + $0x80] sm:$0xf] }
 0x203   : > { %v1814_v20 = vor.u32 %v1935_v62, %v1811_v16  ;;  %v1954_v16 = vld [vmem:[%s2979_s4 + $0xc4] sm:$0xf0] }
 0x204   : > { %v938_v40 = vmax.f32 %v892_v34, 0.0  ;;  %v935_v60 = vmax.f32 %v884_v49, 0.0  ;;  %v1946_v34 = vld [vmem:[%s2979_s4 + $0x84] sm:$0xf0]  ;;  %v1857_v49 = vld [vmem:[%s2979_s4 + $0x90] sm:$0xf]  ;;  %v1882_v25 = vor.u32 %v1954_v16, %v1881_v14 }
 0x206   : > { %v989_v4 = vpack.c.bf16 %v935_v60, %v934_v11 }
 0x207   : > { %v2769_v39 = vpop.permute.xlu1 %1085 }
 0x209   : > { %v893_v29 = vpop.f32.mrf.mxu0 }
 0x20a   : > { %v894_v43 = vadd.f32 %v893_v29, %v2568_v5  ;;  %v877_v5 = vadd.f32 %v2626_v7, %v2573_v8  ;;  %v1929_v8 = vld [vmem:[%s2979_s4 + $0x4] sm:$0xf]  ;;  %v1931_v7 = vld [vmem:[%s2979_s4 + $0x14] sm:$0xf]  ;;  %v1850_v29 = vor.u32 %v1946_v34, %v1849_v54 }
 0x20b   : > { %v1790_v63 = vor.u32 %v1929_v8, %v1787_v52  ;;  %v1798_v24 = vor.u32 %v1931_v7, %v1795_v10  ;;  %v1843_v8 = vld [vmem:[%s2979_s4 + $0x78] sm:$0xf0]  ;;  %v1952_v7 = vld [vmem:[%s2979_s4 + $0xb4] sm:$0xf0]  ;;  %v1945_v10 = vld [vmem:[%s2979_s4 + $0x84] sm:$0xf] }
 0x20c   : > { %v939_v46 = vmax.f32 %v894_v43, 0.0  ;;  %v932_v48 = vmax.f32 %v877_v5, 0.0  ;;  %v2767_v43 = vpop.permute.xlu2 %1095  ;;  %v1846_v56 = vor.u32 %v1943_v51, %v1843_v8 }
 0x20e   : > { %v991_v50 = vpack.c.bf16 %v939_v46, %v938_v40  ;;  %v988_v58 = vpack.c.bf16 %v933_v42, %v932_v48 }
 0x20f   : > { %1366 = vmatmul.bf16.gmra.mxu1 %v1802_v17  ;;  %v2776_v47 = vpop.permute.xlu1 %1060 }
 0x210   : > { %1441 = vmatpush.bf16.msra.mxu2 %v991_v50  ;;  %1981 = vmatpush.bf16.msra.mxu3 %v991_v50  ;;  %v1948_v50 = vld [vmem:[%s2979_s4 + $0x94] sm:$0xf0] }
 0x211   : > { %v1858_v23 = vor.u32 %v1948_v50, %v1857_v49  ;;  %v1889_v49 = vld [vmem:[%s2979_s4 + $0xd0] sm:$0xf]  ;;  %v1956_v50 = vld [vmem:[%s2979_s4 + $0xd4] sm:$0xf0] }
 0x214   : > { %1442 = vmatpush.bf16.msra.mxu2 %v990_v30  ;;  %1982 = vmatpush.bf16.msra.mxu3 %v990_v30  ;;  %v2771_v46 = vpop.permute.xlu2 %1070  ;;  %v2787_v30 = vpop.permute.xlu0 %1105 }
 0x217   : > { %v2791_v11 = vpop.permute.xlu1 %1185 }
 0x218   : > { %1443 = vmatpush.bf16.msra.mxu2 %v989_v4  ;;  %1983 = vmatpush.bf16.msra.mxu3 %v989_v4  ;;  %v1865_v4 = vld [vmem:[%s2979_s4 + $0xa0] sm:$0xf] }
 0x219   : > { %v1866_v55 = vor.u32 %v1950_v2, %v1865_v4  ;;  %v1890_v4 = vor.u32 %v1956_v50, %v1889_v49  ;;  %v1870_v2 = vor.u32 %v1949_v31, %v1867_v38 }
 0x21c   : > { %1444 = vmatpush.bf16.msra.mxu2 %v988_v58  ;;  %1984 = vmatpush.bf16.msra.mxu3 %v988_v58  ;;  %v2789_v5 = vpop.permute.xlu2 %1065  ;;  %v2796_v48 = vpop.permute.xlu0 %1080 }
 0x21f   : > { %1371 = vmatmul.bf16.gmra.mxu1 %v1810_v59  ;;  %1445 = vmatmul.bf16.vlgmr.msra.gmra.mxu2 %v1790_v63  ;;  %v2807_v58 = vpop.permute.xlu1 %1170 }
 0x220   : > { %1515 = vmatmul.bf16.vlgmr.msra.gmra.mxu3 %v1902_v1 }
 0x224   : > { %v1051_v52 = vpop.permute.xlu2 %1050  ;;  %v2809_v63 = vpop.permute.xlu0 %1075 }
 0x227   : > { %v1046_v3 = vpop.permute.xlu1 %1045 }
 0x22c   : > { %v2811_v1 = vpop.permute.xlu2 %1175 }
 0x22f   : > { %1376 = vmatmul.bf16.gmra.mxu1 %v1818_v37  ;;  %1450 = vmatmul.bf16.gmra.mxu2 %v1798_v24  ;;  %v1874_v37 = vor.u32 %v1952_v7, %v1873_v6  ;;  %v1854_v24 = vor.u32 %v1945_v10, %v1851_v26  ;;  %v1031_v12 = vpop.permute.xlu1 %1030  ;;  %v1951_v26 = vld [vmem:[%s2979_s4 + $0xb4] sm:$0xf] }
 0x230   : > { %1520 = vmatmul.bf16.gmra.mxu3 %v1910_v9  ;;  %v2825_v9 = vpop.permute.xlu0 %1180 }
 0x234   : > { %v2827_v57 = vpop.permute.xlu2 %1160 }
 0x238   : > { %v1056_v15 = vpop.permute.xlu0 %1055 }
 0x23c   : > { %v1036_v62 = vpop.permute.xlu2 %1035 }
 0x23f   : > { %1381 = vmatmul.bf16.gmra.mxu1 %v1826_v45  ;;  %1455 = vmatmul.bf16.gmra.mxu2 %v1806_v0 }
 0x240   : > { %v1041_v36 = vpop.permute.xlu0 %1040 }
 0x248   : > { %v2892_v38 = vpop.permute.xlu0 %1165 }
 0x24f   : > { %1386 = vmatmul.bf16.gmra.mxu1 %v1834_v18  ;;  %1460 = vmatmul.bf16.gmra.mxu2 %v1814_v20  ;;  %v1947_v18 = vld [vmem:[%s2979_s4 + $0x94] sm:$0xf]  ;;  %v1859_v20 = vld [vmem:[%s2979_s4 + $0x98] sm:$0xf0] }
 0x25f   : > { %1391 = vmatmul.bf16.gmra.mxu1 %v1842_v27  ;;  %1465 = vmatmul.bf16.gmra.mxu2 %v1822_v53  ;;  %v1862_v27 = vor.u32 %v1947_v18, %v1859_v20  ;;  %v1953_v18 = vld [vmem:[%s2979_s4 + $0xc4] sm:$0xf] }
 0x26c   : > { %v1357_v17 = vpop.f32.mrf.mxu1 }
 0x26d   : > { %v1358_v33 = vadd.f32 %v1357_v17, %v1031_v12 }
 0x26f   : > { %1396 = vmatmul.bf16.gmra.mxu1 %v1850_v29  ;;  %1470 = vmatmul.bf16.gmra.mxu2 %v1830_v19 }
 0x274   : > { %v1359_v40 = vpop.f32.mrf.mxu1 }
 0x275   : > { %v1360_v44 = vadd.f32 %v1359_v40, %v1036_v62 }
 0x27c   : > { %v1362_v60 = vpop.f32.mrf.mxu1 }
 0x27d   : > { %v1363_v29 = vadd.f32 %v1362_v60, %v1041_v36  ;;  %v1955_v36 = vld [vmem:[%s2979_s4 + $0xd4] sm:$0xf] }
 0x27f   : > { %1401 = vmatmul.bf16.gmra.mxu1 %v1858_v23  ;;  %1475 = vmatmul.bf16.gmra.mxu2 %v1838_v41 }
 0x284   : > { %v1364_v42 = vpop.f32.mrf.mxu1 }
 0x285   : > { %v1365_v23 = vadd.f32 %v1364_v42, %v1046_v3  ;;  %v1875_v42 = vld [vmem:[%s2979_s4 + $0xb8] sm:$0xf0] }
 0x286   : > { %v1878_v12 = vor.u32 %v1951_v26, %v1875_v42 }
 0x28c   : > { %v1367_v59 = vpop.f32.mrf.mxu1 }
 0x28f   : > { %1406 = vmatmul.bf16.gmra.mxu1 %v1866_v55  ;;  %1480 = vmatmul.bf16.gmra.mxu2 %v1846_v56  ;;  %v1368_v56 = vadd.f32 %v1367_v59, %v1051_v52 }
 0x294   : > { %v1369_v61 = vpop.f32.mrf.mxu1 }
 0x295   : > { %v1370_v3 = vadd.f32 %v1369_v61, %v1056_v15  ;;  %v1883_v61 = vld [vmem:[%s2979_s4 + $0xc8] sm:$0xf0] }
 0x29c   : > { %v1372_v0 = vpop.f32.mrf.mxu1 }
 0x29f   : > { %1411 = vmatmul.bf16.gmra.mxu1 %v1874_v37  ;;  %1485 = vmatmul.bf16.gmra.mxu2 %v1854_v24 }
 0x2a2   : > { %v1446_v13 = vpop.f32.mrf.mxu2 }
 0x2a3   : > { %v1447_v45 = vadd.f32 %v1446_v13, %v1358_v33 }
 0x2a4   : > { %v1374_v34 = vpop.f32.mrf.mxu1 }
 0x2a5   : > { %v1526_v53 = vmax.f32 %v1447_v45, 0.0  ;;  %v1373_v45 = vadd.f32 %v1372_v0, %v2776_v47  ;;  %v1375_v15 = vadd.f32 %v1374_v34, %v2789_v5  ;;  %v1891_v5 = vld [vmem:[%s2979_s4 + $0xd8] sm:$0xf0] }
 0x2aa   : > { %v1448_v21 = vpop.f32.mrf.mxu2 }
 0x2ab   : > { %v1449_v22 = vadd.f32 %v1448_v21, %v1360_v44  ;;  %v1886_v21 = vor.u32 %v1953_v18, %v1883_v61 }
 0x2ac   : > { %v1377_v40 = vpop.f32.mrf.mxu1 }
 0x2ad   : > { %v1527_v54 = vmax.f32 %v1449_v22, 0.0  ;;  %v1378_v0 = vadd.f32 %v1377_v40, %v2771_v46 }
 0x2af   : > { %1416 = vmatmul.bf16.gmra.mxu1 %v1882_v25  ;;  %1490 = vmatmul.bf16.gmra.mxu2 %v1862_v27  ;;  %v2841_v35 = vpack.c.bf16 %v1527_v54, %v1526_v53 }
 0x2b2   : > { %v1451_v19 = vpop.f32.mrf.mxu2 }
 0x2b3   : > { %v1452_v17 = vadd.f32 %v1451_v19, %v1363_v29  ;;  %v1894_v19 = vor.u32 %v1955_v36, %v1891_v5 }
 0x2b4   : > { %v2857_v6 = vpop.f32.mrf.mxu1 }
 0x2b5   : > { %v1528_v51 = vmax.f32 %v1452_v17, 0.0  ;;  %v2888_v17 = vpop.f32.mrf.mxu3 }
 0x2ba   : > { %v1453_v41 = vpop.f32.mrf.mxu2 }
 0x2bb   : > { %v1454_v60 = vadd.f32 %v1453_v41, %v1365_v23 }
 0x2bc   : > { %v2865_v33 = vpop.f32.mrf.mxu1 }
 0x2bd   : > { %v1529_v8 = vmax.f32 %v1454_v60, 0.0  ;;  %v2890_v46 = vpop.f32.mrf.mxu3 }
 0x2bf   : > { %1421 = vmatmul.bf16.gmra.mxu1 %v1890_v4  ;;  %1495 = vmatmul.bf16.gmra.mxu2 %v1870_v2  ;;  %v2855_v55 = vpack.c.bf16 %v1529_v8, %v1528_v51  ;;  %v2896_v4 = vpop.permute.xlu0 %1150  ;;  %v2898_v8 = vpop.permute.xlu2 %1140 }
 0x2c2   : > { %v1456_v7 = vpop.f32.mrf.mxu2 }
 0x2c3   : > { %v1457_v10 = vadd.f32 %v1456_v7, %v1368_v56 }
 0x2c4   : > { %v1384_v16 = vpop.f32.mrf.mxu1 }
 0x2c5   : > { %v1530_v13 = vmax.f32 %v1457_v10, 0.0  ;;  %v2894_v23 = vpop.f32.mrf.mxu3 }
 0x2c7   : > { %v2902_v26 = vpop.permute.xlu0 %1145  ;;  %v2904_v42 = vpop.permute.xlu2 %1135 }
 0x2ca   : > { %v1458_v37 = vpop.f32.mrf.mxu2 }
 0x2cb   : > { %v1459_v24 = vadd.f32 %v1458_v37, %v1370_v3  ;;  %v1558_v37 = vld [vmem:[%s2981_s6] sm:$0x3] }
 0x2cc   : > { %v1387_v47 = vpop.f32.mrf.mxu1  ;;  %1583 = vst [vmem:[#allocation1] ss:$9 sm:$0xff] %v1558_v37 }
 0x2cd   : > { %v1531_v52 = vmax.f32 %v1459_v24, 0.0  ;;  %v1434_v51 = vpop.f32.mrf.mxu3 }
 0x2cf   : > { %v2867_v59 = vpack.c.bf16 %v1531_v52, %v1530_v13  ;;  %1500 = vmatmul.bf16.gmra.mxu2 %v1878_v12 }
 0x2d2   : > { %v1461_v14 = vpop.f32.mrf.mxu2 }
 0x2d3   : > { %v1462_v62 = vadd.f32 %v1461_v14, %v1373_v45  ;;  %v1388_v45 = vadd.f32 %v1387_v47, %v2753_v32  ;;  %v1380_v32 = vadd.f32 %v2857_v6, %v2809_v63 }
 0x2d4   : > { %v1389_v34 = vpop.f32.mrf.mxu1 }
 0x2d5   : > { %v1532_v22 = vmax.f32 %v1462_v62, 0.0  ;;  %v2900_v10 = vpop.f32.mrf.mxu3  ;;  %v1390_v24 = vadd.f32 %v1389_v34, %v2767_v43  ;;  %v1383_v43 = vadd.f32 %v2865_v33, %v2796_v48 }
 0x2da   : > { %v1463_v20 = vpop.f32.mrf.mxu2 }
 0x2db   : > { %v1464_v44 = vadd.f32 %v1463_v20, %v1375_v15  ;;  %v1385_v15 = vadd.f32 %v1384_v16, %v2769_v39 }
 0x2dc   : > { %v1392_v50 = vpop.f32.mrf.mxu1 }
 0x2dd   : > { %v1533_v25 = vmax.f32 %v1464_v44, 0.0  ;;  %v1393_v3 = vadd.f32 %v1392_v50, %v2751_v28  ;;  %v1518_v61 = vpop.f32.mrf.mxu3  ;;  %v2918_v50 = vpop.permute.xlu1 %1155 }
 0x2df   : > { %v2877_v27 = vpack.c.bf16 %v1533_v25, %v1532_v22  ;;  %1505 = vmatmul.bf16.gmra.mxu2 %v1886_v21  ;;  %v1121_v21 = vpop.permute.xlu0 %1120 }
 0x2e2   : > { %v1466_v53 = vpop.f32.mrf.mxu2 }
 0x2e3   : > { %v2880_v54 = vadd.f32 %v1466_v53, %v1378_v0  ;;  %v1111_v0 = vpop.permute.xlu2 %1110 }
 0x2e4   : > { %v1394_v31 = vpop.f32.mrf.mxu1 }
 0x2e5   : > { %v1395_v12 = vadd.f32 %v1394_v31, %v2787_v30  ;;  %v1521_v33 = vpop.f32.mrf.mxu3  ;;  %v1534_v63 = vmax.f32 %v2880_v54, 0.0  ;;  %v1131_v37 = vpop.permute.xlu1 %1130 }
 0x2ea   : > { %v1468_v29 = vpop.f32.mrf.mxu2 }
 0x2eb   : > { %v1469_v39 = vadd.f32 %v1468_v29, %v1380_v32 }
 0x2ec   : > { %v1397_v60 = vpop.f32.mrf.mxu1 }
 0x2ed   : > { %v1398_v47 = vadd.f32 %v1397_v60, %v1111_v0 }
 0x2ef   : > { %1510 = vmatmul.bf16.gmra.mxu2 %v1894_v19 }
 0x2f2   : > { %v1471_v49 = vpop.f32.mrf.mxu2 }
 0x2f3   : > { %v1472_v53 = vadd.f32 %v1471_v49, %v1383_v43 }
 0x2f4   : > { %v1399_v56 = vpop.f32.mrf.mxu1 }
 0x2f5   : > { %v1536_v31 = vmax.f32 %v1472_v53, 0.0 }
 0x2fa   : > { %v1473_v40 = vpop.f32.mrf.mxu2 }
 0x2fb   : > { %v1474_v22 = vadd.f32 %v1473_v40, %v1385_v15  ;;  %v1535_v40 = vmax.f32 %v1469_v39, 0.0  ;;  %v1430_v15 = vadd.f32 %v2890_v46, %v2811_v1  ;;  %v1584_v46 = vld [vmem:[#allocation1] sm:$0xff] }
 0x2fc   : > { %v1402_v18 = vpop.f32.mrf.mxu1 }
 0x2fd   : > { %v1537_v16 = vmax.f32 %v1474_v22, 0.0  ;;  %v1563_v60 = vpack.c.bf16 %v1535_v40, %v1534_v63 }
 0x302   : > { %v1476_v41 = vpop.f32.mrf.mxu2 }
 0x303   : > { %v1477_v28 = vadd.f32 %v1476_v41, %v1388_v45  ;;  %v1564_v41 = vpack.c.bf16 %v1537_v16, %v1536_v31  ;;  %v1435_v45 = vadd.f32 %v1434_v51, %v2791_v11 }
 0x304   : > { %v1404_v48 = vpop.f32.mrf.mxu1 }
 0x305   : > { %v1538_v36 = vmax.f32 %v1477_v28, 0.0 }
 0x30a   : > { %v1478_v2 = vpop.f32.mrf.mxu2 }
 0x30b   : > { %v1479_v14 = vadd.f32 %v1478_v2, %v1390_v24  ;;  %v1116_v2 = vpop.permute.xlu0 %1115 }
 0x30c   : > { %v1400_v6 = vadd.f32 %v1399_v56, %v1116_v2  ;;  %v1433_v56 = vadd.f32 %v2894_v23, %v2825_v9 }
 0x30d   : > { %v1539_v30 = vmax.f32 %v1479_v14, 0.0 }
 0x30e   : > { %v1522_v28 = vadd.f32 %v1521_v33, %v1433_v56 }
 0x30f   : > { %v1565_v34 = vpack.c.bf16 %v1539_v30, %v1538_v36 }
 0x310   : > { %v1556_v51 = vmax.f32 %v1522_v28, 0.0 }
 0x312   : > { %v1481_v7 = vpop.f32.mrf.mxu2 }
 0x313   : > { %v1482_v13 = vadd.f32 %v1481_v7, %v1393_v3 }
 0x315   : > { %v1540_v20 = vmax.f32 %v1482_v13, 0.0  ;;  %v1523_v13 = vpop.f32.mrf.mxu3 }
 0x31a   : > { %v1483_v52 = vpop.f32.mrf.mxu2 }
 0x31b   : > { %v1484_v62 = vadd.f32 %v1483_v52, %v1395_v12  ;;  %v1407_v12 = vpop.f32.mrf.mxu1  ;;  %v1403_v52 = vadd.f32 %v1402_v18, %v1121_v21  ;;  %v1428_v18 = vadd.f32 %v2888_v17, %v2807_v58 }
 0x31d   : > { %v1541_v44 = vmax.f32 %v1484_v62, 0.0  ;;  %v1524_v62 = vadd.f32 %v1523_v13, %v1435_v45  ;;  %v1517_v11 = vadd.f32 %v2900_v10, %v1428_v18 }
 0x31f   : > { %v1566_v25 = vpack.c.bf16 %v1541_v44, %v1540_v20  ;;  %v1126_v20 = vpop.permute.xlu1 %1125  ;;  %v1519_v44 = vadd.f32 %v1518_v61, %v1430_v15  ;;  %v1408_v61 = vadd.f32 %v1407_v12, %v1131_v37 }
 0x320   : > { %v1405_v21 = vadd.f32 %v1404_v48, %v1126_v20 }
 0x321   : > { %1588 = vmatpush.bf16.msrb.mxu3 %v1566_v25  ;;  %v1554_v25 = vmax.f32 %v1517_v11, 0.0 }
 0x322   : > { %v1486_v5 = vpop.f32.mrf.mxu2 }
 0x323   : > { %v1487_v19 = vadd.f32 %v1486_v5, %v1398_v47  ;;  %v1409_v9 = vpop.f32.mrf.mxu1 }
 0x325   : > { %1589 = vmatpush.bf16.msrb.mxu3 %v1565_v34  ;;  %v1542_v29 = vmax.f32 %v1487_v19, 0.0 }
 0x327   : > { %v1579_v20 = vpop.permute.xlu1 %1578 }
 0x328   : > { %v1581_v18 = vperm.slane %v1579_v20, 0 }
 0x329   : > { %1590 = vmatpush.bf16.msrb.mxu3 %v1564_v41 }
 0x32a   : > { %v1488_v49 = vpop.f32.mrf.mxu2 }
 0x32b   : > { %v1489_v7 = vadd.f32 %v1488_v49, %v1400_v6  ;;  %v1412_v0 = vpop.f32.mrf.mxu1 }
 0x32c   : > { %v1413_v37 = vadd.f32 %v1412_v0, %v2898_v8 }
 0x32d   : > { %v1543_v3 = vmax.f32 %v1489_v7, 0.0  ;;  %1591 = vmatpush.bf16.msrb.mxu3 %v1563_v60 }
 0x32f   : > { %v2921_v24 = vpack.c.bf16 %v1543_v3, %v1542_v29 }
 0x331   : > { %1592 = vmatpush.bf16.msrb.mxu3 %v2877_v27  ;;  %v1557_v27 = vmax.f32 %v1524_v62, 0.0 }
 0x332   : > { %v1491_v14 = vpop.f32.mrf.mxu2 }
 0x333   : > { %v1492_v54 = vadd.f32 %v1491_v14, %v1403_v52  ;;  %v1574_v22 = vpack.c.bf16 %v1557_v27, %v1556_v51  ;;  %v1414_v47 = vpop.f32.mrf.mxu1 }
 0x334   : > { %v1415_v60 = vadd.f32 %v1414_v47, %v2902_v26 }
 0x335   : > { %1593 = vmatpush.bf16.msrb.mxu3 %v2867_v59  ;;  %v1555_v59 = vmax.f32 %v1519_v44, 0.0  ;;  %v1544_v30 = vmax.f32 %v1492_v54, 0.0 }
 0x337   : > { %v1573_v17 = vpack.c.bf16 %v1555_v59, %v1554_v25 }
 0x339   : > { %1594 = vmatpush.bf16.msrb.mxu3 %v2855_v55 }
 0x33a   : > { %v1493_v23 = vpop.f32.mrf.mxu2 }
 0x33b   : > { %v1494_v43 = vadd.f32 %v1493_v23, %v1405_v21  ;;  %v1417_v36 = vpop.f32.mrf.mxu1 }
 0x33c   : > { %v1418_v63 = vadd.f32 %v1417_v36, %v2896_v4 }
 0x33d   : > { %v1545_v1 = vmax.f32 %v1494_v43, 0.0  ;;  %1595 = vmatpush.bf16.msrb.mxu3 %v2841_v35 }
 0x33f   : > { %v1568_v58 = vpack.c.bf16 %v1545_v1, %v1544_v30 }
 0x340   : > { %1596 = vmatmul.bf16.vlgmr.msrb.gmra.mxu3 %v1584_v46 }
 0x341   : > { %1601 = vmatpush.bf16.msra.mxu3 %v1574_v22 }
 0x342   : > { %v1496_v55 = vpop.f32.mrf.mxu2 }
 0x343   : > { %v1497_v10 = vadd.f32 %v1496_v55, %v1408_v61  ;;  %v1419_v39 = vpop.f32.mrf.mxu1 }
 0x344   : > { %v1420_v33 = vadd.f32 %v1419_v39, %v2918_v50  ;;  %v1410_v50 = vadd.f32 %v1409_v9, %v2904_v42  ;;  %v1585_v42 = vld [vmem:[#allocation1 + $0x9] sm:$0xff] }
 0x345   : > { %1602 = vmatpush.bf16.msra.mxu3 %v1573_v17  ;;  %v1546_v62 = vmax.f32 %v1497_v10, 0.0 }
 0x34a   : > { %v1498_v32 = vpop.f32.mrf.mxu2 }
 0x34b   : > { %v1422_v35 = vpop.f32.mrf.mxu1  ;;  %v1499_v45 = vadd.f32 %v1498_v32, %v1410_v50 }
 0x34c   : > { %v1423_v48 = vadd.f32 %v1422_v35, %v2827_v57 }
 0x34d   : > { %v1547_v26 = vmax.f32 %v1499_v45, 0.0 }
 0x34f   : > { %v1569_v8 = vpack.c.bf16 %v1547_v26, %v1546_v62 }
 0x352   : > { %v1501_v53 = vpop.f32.mrf.mxu2 }
 0x353   : > { %v1424_v31 = vpop.f32.mrf.mxu1  ;;  %v1502_v52 = vadd.f32 %v1501_v53, %v1413_v37 }
 0x354   : > { %v1425_v40 = vadd.f32 %v1424_v31, %v2892_v38 }
 0x355   : > { %v1548_v54 = vmax.f32 %v1502_v52, 0.0 }
 0x35a   : > { %v1503_v5 = vpop.f32.mrf.mxu2 }
 0x35b   : > { %v1504_v12 = vadd.f32 %v1503_v5, %v1415_v60 }
 0x35d   : > { %v1549_v14 = vmax.f32 %v1504_v12, 0.0 }
 0x35f   : > { %v1570_v56 = vpack.c.bf16 %v1549_v14, %v1548_v54 }
 0x362   : > { %v1506_v16 = vpop.f32.mrf.mxu2 }
 0x363   : > { %v1507_v7 = vadd.f32 %v1506_v16, %v1418_v63 }
 0x365   : > { %v1550_v38 = vmax.f32 %v1507_v7, 0.0 }
 0x36a   : > { %v1508_v34 = vpop.f32.mrf.mxu2 }
 0x36b   : > { %v1509_v6 = vadd.f32 %v1508_v34, %v1420_v33 }
 0x36d   : > { %v1551_v13 = vmax.f32 %v1509_v6, 0.0 }
 0x36f   : > { %v1571_v4 = vpack.c.bf16 %v1551_v13, %v1550_v38 }
 0x372   : > { %v1511_v19 = vpop.f32.mrf.mxu2 }
 0x373   : > { %v1512_v41 = vadd.f32 %v1511_v19, %v1423_v48 }
 0x375   : > { %v1552_v29 = vmax.f32 %v1512_v41, 0.0 }
 0x37a   : > { %v1513_v2 = vpop.f32.mrf.mxu2 }
 0x37b   : > { %v1514_v49 = vadd.f32 %v1513_v2, %v1425_v40 }
 0x37d   : > { %v1553_v3 = vmax.f32 %v1514_v49, 0.0 }
 0x37f   : > { %v1572_v57 = vpack.c.bf16 %v1553_v3, %v1552_v29 }
 0x381   : > { %1603 = vmatpush.bf16.msra.mxu3 %v1572_v57 }
 0x385   : > { %1604 = vmatpush.bf16.msra.mxu3 %v1571_v4 }
 0x389   : > { %1605 = vmatpush.bf16.msra.mxu3 %v1570_v56 }
 0x38d   : > { %1606 = vmatpush.bf16.msra.mxu3 %v1569_v8 }
 0x391   : > { %1607 = vmatpush.bf16.msra.mxu3 %v1568_v58 }
 0x395   : > { %1608 = vmatpush.bf16.msra.mxu3 %v2921_v24 }
 0x398   : > { %1609 = vmatmul.bf16.vlgmr.msra.gmra.mxu3 %v1585_v42 }
 0x3c3   : > { %v1597_v15 = vpop.f32.mrf.mxu3 }
 0x3c4   : > { %v1598_v44 = vadd.f32 %v1597_v15, %v1581_v18 }
 0x3cb   : > { %v1599_v28 = vpop.f32.mrf.mxu3 }
 0x41b   : > { %v1610_v27 = vpop.f32.mrf.mxu3 }
 0x41c   : > { %v1611_v21 = vadd.f32 %v1610_v27, %v1598_v44 }
 0x41e   : > { %1614 = vst [vmem:[%s316_s18] sm:$0x1] %v1611_v21 }
 0x41f   : > { %2096 = shalt.err (!%p2093_p3)
}
 0x420   : > { %1985 = dma.vmem_to_hbm [thread:$0]  (%p2221_p5), %s1627_s19, 16, %s1629_s14, %s1616_s20  }
 0x423   : > { %v1612_v24 = vpop.f32.mrf.mxu3 }
 0x424 PF: > { %p1991_p4 = scmp.ge.s32.totalorder %s2131_s10, 2  ;;  %s1640_s28 = sand.u32 1, %s2119_s29  }
 0x425   : > { %s1641_s11 = scalar_lea.sflag [#allocation4], %s1640_s28 }
 0x426   : > { %p1988_p7 = pnand %p1991_p4, %p2225_p6 }
 0x428   : > { %p1989_p8 = pneg %p1988_p7 }
 0x42a   : > { %2114 = dma.done.wait (%p1989_p8), %s1641_s11, 16  }
 0x42b   : > { %2116 = vsyncadd (%p1989_p8), %s1641_s11, 4294967280  ;;  %p20_p9 = scmp.ge.s32.totalorder %s2208_s12, 4   ;;  %s2986_s29 = smov %s2123_s30 }
 0x42c   : > { %s2987_s30 = smov %s2127_s9  ;;  %s2988_s9 = smov %s2219_s15 }
 0x42d   : > { %s2989_s10 = smov %s2208_s12  ;;  %22 = sbr.rel (!%p20_p9) target bundleno = 6 (0x6), region = 90 }
 0x432   :  { %1646 = vsyncpa [#allocation4], 1 }
 0x433   :  { %1648 = vsyncpa [#allocation4 + $0x1], 1 }

</bundles_post_ra>
